<compile_context>
chip_gen: v5e
topology: v5e:2x2
jax: 0.10.0
libtpu: 0.0.40
codegen_flags: <defaults>
</compile_context>

<pallas_src>
import functools

import jax
import jax.numpy as jnp
from jax.experimental import pallas as pl
from jax.experimental.pallas import tpu as pltpu

# ---------------- model hyper-parameters (small, forward-consistent) ---------
INPUT_DIM = 50        # vocab size (len(de_vocab) stand-in)
EMB_DIM = 32          # embedding_dim
HIDDEN_DIM = 32       # hidden_dim  (4*H = 128 lanes -> one full vreg row)
N_LAYERS = 2          # n_layers
SEQ_LEN = 8
BATCH = 4
SUBLANE = 8           # pad batch to full sublanes (inside the kernel, free)


# ----------------------------- Pallas kernel ---------------------------------
def _lstm_cell(gates, c, H):
    """PyTorch gate order i, f, g, o.  gates: (Bp, 4H), c: (Bp, H)."""
    # Two full-vreg EUP passes over the whole 128-lane tile, then lane slices.
    sig = jax.nn.sigmoid(gates)
    th = jnp.tanh(gates)
    i_g = sig[:, 0 * H:1 * H]
    f_g = sig[:, 1 * H:2 * H]
    g_g = th[:, 2 * H:3 * H]
    o_g = sig[:, 3 * H:4 * H]
    c_new = f_g * c + i_g * g_g
    h_new = o_g * jnp.tanh(c_new)
    return h_new, c_new


def _encoder_kernel(T, B, Bp, H,
                    src_ref, proj_ref, whh0_ref, w1_ref, b1_ref, out_ref):
    """Fused embedding-gather + 2-layer LSTM over the full sequence.

    src_ref  : (T, B)  int32 token ids in SMEM
    proj_ref : (V, 1, 4H) pre-projected layer-0 gate table:
               embedding @ w_ih_l0.T + (b_ih0 + b_hh0)
    whh0_ref : (H, 4H)   layer-0 hidden->hidden weights (pre-transposed)
    w1_ref   : (2H, 4H)  layer-1 fused [w_ih_l1.T ; w_hh_l1.T]
    b1_ref   : (1, 4H)   layer-1 b_ih + b_hh
    out_ref  : (Bp, 4H)  lane-dense [h0 | h1 | c0 | c1] final states
    """
    # Hoist weight loads out of the recurrence.
    whh0 = whh0_ref[...]
    w1 = w1_ref[...]
    b1 = b1_ref[...]

    # In-kernel embedding gather: one lane-dense (1, 4H) row per (t, b).
    # These do not depend on the recurrence -> off the serial critical path.
    pad_rows = Bp - B
    pad = jnp.zeros((pad_rows, 4 * H), jnp.float32) if pad_rows else None
    xs = []
    for t in range(T):
        rows = [proj_ref[src_ref[t, b]] for b in range(B)]   # each (1, 4H)
        if pad_rows:
            rows.append(pad)
        xs.append(jnp.concatenate(rows, axis=0))             # (Bp, 4H)

    h0 = jnp.zeros((Bp, H), jnp.float32)
    c0 = jnp.zeros((Bp, H), jnp.float32)
    h1 = jnp.zeros((Bp, H), jnp.float32)
    c1 = jnp.zeros((Bp, H), jnp.float32)

    # Time recurrence, fully unrolled (T is small and static).
    for t in range(T):
        # ---- layer 0: only the h-dependent matmul is in the chain ----
        g0 = xs[t] + jnp.dot(h0, whh0, preferred_element_type=jnp.float32)
        h0, c0 = _lstm_cell(g0, c0, H)

        # ---- layer 1: single fused (Bp,2H)@(2H,4H) matmul ----
        g1 = jnp.dot(jnp.concatenate([h0, h1], axis=-1), w1,
                     preferred_element_type=jnp.float32) + b1
        h1, c1 = _lstm_cell(g1, c1, H)

    # Single lane-dense (Bp, 128) store; split in the wrapper.
    out_ref[...] = jnp.concatenate([h0, h1, c0, c1], axis=-1)


# ----------------------------- parameters ------------------------------------
def init_params(key):
    """PyTorch-layout parameters (same as nn.Embedding + nn.LSTM)."""
    params = {}
    k_emb, key = jax.random.split(key)
    bound = 1.0 / jnp.sqrt(HIDDEN_DIM)
    params["embedding"] = jax.random.normal(
        k_emb, (INPUT_DIM, EMB_DIM), jnp.float32) * 0.1
    for layer in range(N_LAYERS):
        in_dim = EMB_DIM if layer == 0 else HIDDEN_DIM
        k1, k2, k3, k4, key = jax.random.split(key, 5)
        params[f"w_ih_l{layer}"] = jax.random.uniform(
            k1, (4 * HIDDEN_DIM, in_dim), jnp.float32, -bound, bound)
        params[f"w_hh_l{layer}"] = jax.random.uniform(
            k2, (4 * HIDDEN_DIM, HIDDEN_DIM), jnp.float32, -bound, bound)
        params[f"b_ih_l{layer}"] = jax.random.uniform(
            k3, (4 * HIDDEN_DIM,), jnp.float32, -bound, bound)
        params[f"b_hh_l{layer}"] = jax.random.uniform(
            k4, (4 * HIDDEN_DIM,), jnp.float32, -bound, bound)
    return params


def prepare_params(params):
    """One-time prep (outside the per-forward path): transposes, bias fusion,
    and the pre-projected (vocab, 4H) layer-0 gate table."""
    H = HIDDEN_DIM
    b0 = (params["b_ih_l0"] + params["b_hh_l0"]).astype(jnp.float32)
    proj = (params["embedding"].astype(jnp.float32)
            @ params["w_ih_l0"].T.astype(jnp.float32) + b0)      # (V, 4H)
    proj = proj.reshape(INPUT_DIM, 1, 4 * H)   # leading-dim gather layout
    whh0 = params["w_hh_l0"].T.astype(jnp.float32)                # (H, 4H)
    w1 = jnp.concatenate([params["w_ih_l1"].T, params["w_hh_l1"].T],
                         axis=0).astype(jnp.float32)              # (2H, 4H)
    b1 = (params["b_ih_l1"] + params["b_hh_l1"]).reshape(
        1, 4 * H).astype(jnp.float32)                             # (1, 4H)
    return {"proj": proj, "whh0": whh0, "w1": w1, "b1": b1}


# ----------------------------- Encoder forward --------------------------------
@jax.jit
def encoder_forward(src, prep):
    """src: (T, B) int32 token ids. Returns (hidden, cell), each (n_layers, B, H)."""
    assert N_LAYERS == 2
    T, B = src.shape
    H = HIDDEN_DIM
    V = prep["proj"].shape[0]
    Bp = ((B + SUBLANE - 1) // SUBLANE) * SUBLANE   # full-sublane batch inside kernel

    kernel = functools.partial(_encoder_kernel, T, B, Bp, H)

    # Advisory cost estimate for the XLA scheduler.
    mxu_flops = T * (2 * Bp * H * (4 * H) + 2 * Bp * (2 * H) * (4 * H))
    vpu_flops = T * N_LAYERS * 10 * Bp * 4 * H
    transc = T * N_LAYERS * (2 * Bp * 4 * H + Bp * H)
    bytes_acc = (T * B * 4 + V * 4 * H * 4 + H * 4 * H * 4
                 + 2 * H * 4 * H * 4 + 4 * H * 4 + Bp * 4 * H * 4)

    out = pl.pallas_call(
        kernel,
        out_shape=jax.ShapeDtypeStruct((Bp, 4 * H), jnp.float32),
        in_specs=[
            pl.BlockSpec(memory_space=pltpu.MemorySpace.SMEM),   # src ids
            pl.BlockSpec(memory_space=pltpu.MemorySpace.VMEM),   # proj table
            pl.BlockSpec(memory_space=pltpu.MemorySpace.VMEM),   # whh0
            pl.BlockSpec(memory_space=pltpu.MemorySpace.VMEM),   # w1
            pl.BlockSpec(memory_space=pltpu.MemorySpace.VMEM),   # b1
        ],
        out_specs=pl.BlockSpec(memory_space=pltpu.MemorySpace.VMEM),
        cost_estimate=pl.CostEstimate(flops=mxu_flops + vpu_flops,
                                      transcendentals=transc,
                                      bytes_accessed=bytes_acc),
    )(src, prep["proj"], prep["whh0"], prep["w1"], prep["b1"])

    # out rows (real batch only): [h0 | h1 | c0 | c1] -> (2*L, B, H)
    hc = out[:B].reshape(B, 2 * N_LAYERS, H).transpose(1, 0, 2)
    return hc[:N_LAYERS], hc[N_LAYERS:]


# ----------------------------- pure-JAX reference ------------------------------
def lstm_layer_ref(x, w_ih, w_hh, b_ih, b_hh):
    T, B, _ = x.shape
    H = w_hh.shape[1]
    b = b_ih + b_hh

    def step(carry, x_t):
        h, c = carry
        gates = x_t @ w_ih.T + h @ w_hh.T + b
        i_g = jax.nn.sigmoid(gates[:, 0 * H:1 * H])
        f_g = jax.nn.sigmoid(gates[:, 1 * H:2 * H])
        g_g = jnp.tanh(gates[:, 2 * H:3 * H])
        o_g = jax.nn.sigmoid(gates[:, 3 * H:4 * H])
        c_new = f_g * c + i_g * g_g
        h_new = o_g * jnp.tanh(c_new)
        return (h_new, c_new), h_new

    h0 = jnp.zeros((B, H), jnp.float32)
    c0 = jnp.zeros((B, H), jnp.float32)
    (h_n, c_n), outs = jax.lax.scan(step, (h0, c0), x)
    return outs, h_n, c_n


def encoder_forward_ref(src, params):
    x = params["embedding"][src]
    hiddens, cells = [], []
    for layer in range(N_LAYERS):
        outs, h_n, c_n = lstm_layer_ref(
            x,
            params[f"w_ih_l{layer}"], params[f"w_hh_l{layer}"],
            params[f"b_ih_l{layer}"], params[f"b_hh_l{layer}"])
        x = outs
        hiddens.append(h_n)
        cells.append(c_n)
    return jnp.stack(hiddens), jnp.stack(cells)


# ------------------------------------ main -------------------------------------
if __name__ == "__main__":
    key = jax.random.PRNGKey(0)
    k_src, k_params = jax.random.split(key)

    params = init_params(k_params)
    prep = prepare_params(params)     # one-time; not in the per-forward path
    src = jax.random.randint(k_src, (SEQ_LEN, BATCH), 0, INPUT_DIM, jnp.int32)

    hidden, cell = encoder_forward(src, prep)
    hidden, cell = jax.block_until_ready((hidden, cell))

    hidden_ref, cell_ref = encoder_forward_ref(src, params)
    assert hidden.shape == (N_LAYERS, BATCH, HIDDEN_DIM)
    assert cell.shape == (N_LAYERS, BATCH, HIDDEN_DIM)
    assert jnp.allclose(hidden, hidden_ref, atol=1e-5, rtol=1e-5)
    assert jnp.allclose(cell, cell_ref, atol=1e-5, rtol=1e-5)

    print("KERNEL_OK")
</pallas_src>

<mosaic_0001>
module attributes {stable_mosaic.version = 11 : i64} {
  func.func @_encoder_kernel(%arg0: memref<8x4xi32, #tpu.memory_space<smem>>, %arg1: memref<50x1x128xf32, #tpu.memory_space<vmem>>, %arg2: memref<32x128xf32, #tpu.memory_space<vmem>>, %arg3: memref<64x128xf32, #tpu.memory_space<vmem>>, %arg4: memref<1x128xf32, #tpu.memory_space<vmem>>, %arg5: memref<8x128xf32, #tpu.memory_space<vmem>>) attributes {dimension_semantics = [], scalar_prefetch = 0 : i64, scratch_operands = 0 : i64, tpu.core_type = #tpu.core_type<tc>} {
    %c0 = arith.constant 0 : index
    %c0_0 = arith.constant 0 : index
    %0 = vector.load %arg2[%c0, %c0_0] : memref<32x128xf32, #tpu.memory_space<vmem>>, vector<32x128xf32>
    %c0_1 = arith.constant 0 : index
    %c0_2 = arith.constant 0 : index
    %1 = vector.load %arg3[%c0_1, %c0_2] : memref<64x128xf32, #tpu.memory_space<vmem>>, vector<64x128xf32>
    %c0_3 = arith.constant 0 : index
    %c0_4 = arith.constant 0 : index
    %2 = vector.load %arg4[%c0_3, %c0_4] : memref<1x128xf32, #tpu.memory_space<vmem>>, vector<1x128xf32>
    %cst = arith.constant 0.000000e+00 : f32
    %3 = vector.broadcast %cst : f32 to vector<4x128xf32>
    %c0_5 = arith.constant 0 : index
    %c0_6 = arith.constant 0 : index
    %4 = memref.load %arg0[%c0_5, %c0_6] : memref<8x4xi32, #tpu.memory_space<smem>>
    %5 = arith.index_cast %4 : i32 to index
    %c0_7 = arith.constant 0 : index
    %c0_8 = arith.constant 0 : index
    %6 = vector.load %arg1[%5, %c0_7, %c0_8] : memref<50x1x128xf32, #tpu.memory_space<vmem>>, vector<1x1x128xf32>
    %7 = vector.shape_cast %6 : vector<1x1x128xf32> to vector<1x128xf32>
    %c0_9 = arith.constant 0 : index
    %c1 = arith.constant 1 : index
    %8 = memref.load %arg0[%c0_9, %c1] : memref<8x4xi32, #tpu.memory_space<smem>>
    %9 = arith.index_cast %8 : i32 to index
    %c0_10 = arith.constant 0 : index
    %c0_11 = arith.constant 0 : index
    %10 = vector.load %arg1[%9, %c0_10, %c0_11] : memref<50x1x128xf32, #tpu.memory_space<vmem>>, vector<1x1x128xf32>
    %11 = vector.shape_cast %10 : vector<1x1x128xf32> to vector<1x128xf32>
    %c0_12 = arith.constant 0 : index
    %c2 = arith.constant 2 : index
    %12 = memref.load %arg0[%c0_12, %c2] : memref<8x4xi32, #tpu.memory_space<smem>>
    %13 = arith.index_cast %12 : i32 to index
    %c0_13 = arith.constant 0 : index
    %c0_14 = arith.constant 0 : index
    %14 = vector.load %arg1[%13, %c0_13, %c0_14] : memref<50x1x128xf32, #tpu.memory_space<vmem>>, vector<1x1x128xf32>
    %15 = vector.shape_cast %14 : vector<1x1x128xf32> to vector<1x128xf32>
    %c0_15 = arith.constant 0 : index
    %c3 = arith.constant 3 : index
    %16 = memref.load %arg0[%c0_15, %c3] : memref<8x4xi32, #tpu.memory_space<smem>>
    %17 = arith.index_cast %16 : i32 to index
    %c0_16 = arith.constant 0 : index
    %c0_17 = arith.constant 0 : index
    %18 = vector.load %arg1[%17, %c0_16, %c0_17] : memref<50x1x128xf32, #tpu.memory_space<vmem>>, vector<1x1x128xf32>
    %19 = vector.shape_cast %18 : vector<1x1x128xf32> to vector<1x128xf32>
    %20 = tpu.concatenate %7, %11, %15, %19, %3 in 0 : vector<1x128xf32>, vector<1x128xf32>, vector<1x128xf32>, vector<1x128xf32>, vector<4x128xf32> -> vector<8x128xf32>
    %c1_18 = arith.constant 1 : index
    %c0_19 = arith.constant 0 : index
    %21 = memref.load %arg0[%c1_18, %c0_19] : memref<8x4xi32, #tpu.memory_space<smem>>
    %22 = arith.index_cast %21 : i32 to index
    %c0_20 = arith.constant 0 : index
    %c0_21 = arith.constant 0 : index
    %23 = vector.load %arg1[%22, %c0_20, %c0_21] : memref<50x1x128xf32, #tpu.memory_space<vmem>>, vector<1x1x128xf32>
    %24 = vector.shape_cast %23 : vector<1x1x128xf32> to vector<1x128xf32>
    %c1_22 = arith.constant 1 : index
    %c1_23 = arith.constant 1 : index
    %25 = memref.load %arg0[%c1_22, %c1_23] : memref<8x4xi32, #tpu.memory_space<smem>>
    %26 = arith.index_cast %25 : i32 to index
    %c0_24 = arith.constant 0 : index
    %c0_25 = arith.constant 0 : index
    %27 = vector.load %arg1[%26, %c0_24, %c0_25] : memref<50x1x128xf32, #tpu.memory_space<vmem>>, vector<1x1x128xf32>
    %28 = vector.shape_cast %27 : vector<1x1x128xf32> to vector<1x128xf32>
    %c1_26 = arith.constant 1 : index
    %c2_27 = arith.constant 2 : index
    %29 = memref.load %arg0[%c1_26, %c2_27] : memref<8x4xi32, #tpu.memory_space<smem>>
    %30 = arith.index_cast %29 : i32 to index
    %c0_28 = arith.constant 0 : index
    %c0_29 = arith.constant 0 : index
    %31 = vector.load %arg1[%30, %c0_28, %c0_29] : memref<50x1x128xf32, #tpu.memory_space<vmem>>, vector<1x1x128xf32>
    %32 = vector.shape_cast %31 : vector<1x1x128xf32> to vector<1x128xf32>
    %c1_30 = arith.constant 1 : index
    %c3_31 = arith.constant 3 : index
    %33 = memref.load %arg0[%c1_30, %c3_31] : memref<8x4xi32, #tpu.memory_space<smem>>
    %34 = arith.index_cast %33 : i32 to index
    %c0_32 = arith.constant 0 : index
    %c0_33 = arith.constant 0 : index
    %35 = vector.load %arg1[%34, %c0_32, %c0_33] : memref<50x1x128xf32, #tpu.memory_space<vmem>>, vector<1x1x128xf32>
    %36 = vector.shape_cast %35 : vector<1x1x128xf32> to vector<1x128xf32>
    %37 = tpu.concatenate %24, %28, %32, %36, %3 in 0 : vector<1x128xf32>, vector<1x128xf32>, vector<1x128xf32>, vector<1x128xf32>, vector<4x128xf32> -> vector<8x128xf32>
    %c2_34 = arith.constant 2 : index
    %c0_35 = arith.constant 0 : index
    %38 = memref.load %arg0[%c2_34, %c0_35] : memref<8x4xi32, #tpu.memory_space<smem>>
    %39 = arith.index_cast %38 : i32 to index
    %c0_36 = arith.constant 0 : index
    %c0_37 = arith.constant 0 : index
    %40 = vector.load %arg1[%39, %c0_36, %c0_37] : memref<50x1x128xf32, #tpu.memory_space<vmem>>, vector<1x1x128xf32>
    %41 = vector.shape_cast %40 : vector<1x1x128xf32> to vector<1x128xf32>
    %c2_38 = arith.constant 2 : index
    %c1_39 = arith.constant 1 : index
    %42 = memref.load %arg0[%c2_38, %c1_39] : memref<8x4xi32, #tpu.memory_space<smem>>
    %43 = arith.index_cast %42 : i32 to index
    %c0_40 = arith.constant 0 : index
    %c0_41 = arith.constant 0 : index
    %44 = vector.load %arg1[%43, %c0_40, %c0_41] : memref<50x1x128xf32, #tpu.memory_space<vmem>>, vector<1x1x128xf32>
    %45 = vector.shape_cast %44 : vector<1x1x128xf32> to vector<1x128xf32>
    %c2_42 = arith.constant 2 : index
    %c2_43 = arith.constant 2 : index
    %46 = memref.load %arg0[%c2_42, %c2_43] : memref<8x4xi32, #tpu.memory_space<smem>>
    %47 = arith.index_cast %46 : i32 to index
    %c0_44 = arith.constant 0 : index
    %c0_45 = arith.constant 0 : index
    %48 = vector.load %arg1[%47, %c0_44, %c0_45] : memref<50x1x128xf32, #tpu.memory_space<vmem>>, vector<1x1x128xf32>
    %49 = vector.shape_cast %48 : vector<1x1x128xf32> to vector<1x128xf32>
    %c2_46 = arith.constant 2 : index
    %c3_47 = arith.constant 3 : index
    %50 = memref.load %arg0[%c2_46, %c3_47] : memref<8x4xi32, #tpu.memory_space<smem>>
    %51 = arith.index_cast %50 : i32 to index
    %c0_48 = arith.constant 0 : index
    %c0_49 = arith.constant 0 : index
    %52 = vector.load %arg1[%51, %c0_48, %c0_49] : memref<50x1x128xf32, #tpu.memory_space<vmem>>, vector<1x1x128xf32>
    %53 = vector.shape_cast %52 : vector<1x1x128xf32> to vector<1x128xf32>
    %54 = tpu.concatenate %41, %45, %49, %53, %3 in 0 : vector<1x128xf32>, vector<1x128xf32>, vector<1x128xf32>, vector<1x128xf32>, vector<4x128xf32> -> vector<8x128xf32>
    %c3_50 = arith.constant 3 : index
    %c0_51 = arith.constant 0 : index
    %55 = memref.load %arg0[%c3_50, %c0_51] : memref<8x4xi32, #tpu.memory_space<smem>>
    %56 = arith.index_cast %55 : i32 to index
    %c0_52 = arith.constant 0 : index
    %c0_53 = arith.constant 0 : index
    %57 = vector.load %arg1[%56, %c0_52, %c0_53] : memref<50x1x128xf32, #tpu.memory_space<vmem>>, vector<1x1x128xf32>
    %58 = vector.shape_cast %57 : vector<1x1x128xf32> to vector<1x128xf32>
    %c3_54 = arith.constant 3 : index
    %c1_55 = arith.constant 1 : index
    %59 = memref.load %arg0[%c3_54, %c1_55] : memref<8x4xi32, #tpu.memory_space<smem>>
    %60 = arith.index_cast %59 : i32 to index
    %c0_56 = arith.constant 0 : index
    %c0_57 = arith.constant 0 : index
    %61 = vector.load %arg1[%60, %c0_56, %c0_57] : memref<50x1x128xf32, #tpu.memory_space<vmem>>, vector<1x1x128xf32>
    %62 = vector.shape_cast %61 : vector<1x1x128xf32> to vector<1x128xf32>
    %c3_58 = arith.constant 3 : index
    %c2_59 = arith.constant 2 : index
    %63 = memref.load %arg0[%c3_58, %c2_59] : memref<8x4xi32, #tpu.memory_space<smem>>
    %64 = arith.index_cast %63 : i32 to index
    %c0_60 = arith.constant 0 : index
    %c0_61 = arith.constant 0 : index
    %65 = vector.load %arg1[%64, %c0_60, %c0_61] : memref<50x1x128xf32, #tpu.memory_space<vmem>>, vector<1x1x128xf32>
    %66 = vector.shape_cast %65 : vector<1x1x128xf32> to vector<1x128xf32>
    %c3_62 = arith.constant 3 : index
    %c3_63 = arith.constant 3 : index
    %67 = memref.load %arg0[%c3_62, %c3_63] : memref<8x4xi32, #tpu.memory_space<smem>>
    %68 = arith.index_cast %67 : i32 to index
    %c0_64 = arith.constant 0 : index
    %c0_65 = arith.constant 0 : index
    %69 = vector.load %arg1[%68, %c0_64, %c0_65] : memref<50x1x128xf32, #tpu.memory_space<vmem>>, vector<1x1x128xf32>
    %70 = vector.shape_cast %69 : vector<1x1x128xf32> to vector<1x128xf32>
    %71 = tpu.concatenate %58, %62, %66, %70, %3 in 0 : vector<1x128xf32>, vector<1x128xf32>, vector<1x128xf32>, vector<1x128xf32>, vector<4x128xf32> -> vector<8x128xf32>
    %c4 = arith.constant 4 : index
    %c0_66 = arith.constant 0 : index
    %72 = memref.load %arg0[%c4, %c0_66] : memref<8x4xi32, #tpu.memory_space<smem>>
    %73 = arith.index_cast %72 : i32 to index
    %c0_67 = arith.constant 0 : index
    %c0_68 = arith.constant 0 : index
    %74 = vector.load %arg1[%73, %c0_67, %c0_68] : memref<50x1x128xf32, #tpu.memory_space<vmem>>, vector<1x1x128xf32>
    %75 = vector.shape_cast %74 : vector<1x1x128xf32> to vector<1x128xf32>
    %c4_69 = arith.constant 4 : index
    %c1_70 = arith.constant 1 : index
    %76 = memref.load %arg0[%c4_69, %c1_70] : memref<8x4xi32, #tpu.memory_space<smem>>
    %77 = arith.index_cast %76 : i32 to index
    %c0_71 = arith.constant 0 : index
    %c0_72 = arith.constant 0 : index
    %78 = vector.load %arg1[%77, %c0_71, %c0_72] : memref<50x1x128xf32, #tpu.memory_space<vmem>>, vector<1x1x128xf32>
    %79 = vector.shape_cast %78 : vector<1x1x128xf32> to vector<1x128xf32>
    %c4_73 = arith.constant 4 : index
    %c2_74 = arith.constant 2 : index
    %80 = memref.load %arg0[%c4_73, %c2_74] : memref<8x4xi32, #tpu.memory_space<smem>>
    %81 = arith.index_cast %80 : i32 to index
    %c0_75 = arith.constant 0 : index
    %c0_76 = arith.constant 0 : index
    %82 = vector.load %arg1[%81, %c0_75, %c0_76] : memref<50x1x128xf32, #tpu.memory_space<vmem>>, vector<1x1x128xf32>
    %83 = vector.shape_cast %82 : vector<1x1x128xf32> to vector<1x128xf32>
    %c4_77 = arith.constant 4 : index
    %c3_78 = arith.constant 3 : index
    %84 = memref.load %arg0[%c4_77, %c3_78] : memref<8x4xi32, #tpu.memory_space<smem>>
    %85 = arith.index_cast %84 : i32 to index
    %c0_79 = arith.constant 0 : index
    %c0_80 = arith.constant 0 : index
    %86 = vector.load %arg1[%85, %c0_79, %c0_80] : memref<50x1x128xf32, #tpu.memory_space<vmem>>, vector<1x1x128xf32>
    %87 = vector.shape_cast %86 : vector<1x1x128xf32> to vector<1x128xf32>
    %88 = tpu.concatenate %75, %79, %83, %87, %3 in 0 : vector<1x128xf32>, vector<1x128xf32>, vector<1x128xf32>, vector<1x128xf32>, vector<4x128xf32> -> vector<8x128xf32>
    %c5 = arith.constant 5 : index
    %c0_81 = arith.constant 0 : index
    %89 = memref.load %arg0[%c5, %c0_81] : memref<8x4xi32, #tpu.memory_space<smem>>
    %90 = arith.index_cast %89 : i32 to index
    %c0_82 = arith.constant 0 : index
    %c0_83 = arith.constant 0 : index
    %91 = vector.load %arg1[%90, %c0_82, %c0_83] : memref<50x1x128xf32, #tpu.memory_space<vmem>>, vector<1x1x128xf32>
    %92 = vector.shape_cast %91 : vector<1x1x128xf32> to vector<1x128xf32>
    %c5_84 = arith.constant 5 : index
    %c1_85 = arith.constant 1 : index
    %93 = memref.load %arg0[%c5_84, %c1_85] : memref<8x4xi32, #tpu.memory_space<smem>>
    %94 = arith.index_cast %93 : i32 to index
    %c0_86 = arith.constant 0 : index
    %c0_87 = arith.constant 0 : index
    %95 = vector.load %arg1[%94, %c0_86, %c0_87] : memref<50x1x128xf32, #tpu.memory_space<vmem>>, vector<1x1x128xf32>
    %96 = vector.shape_cast %95 : vector<1x1x128xf32> to vector<1x128xf32>
    %c5_88 = arith.constant 5 : index
    %c2_89 = arith.constant 2 : index
    %97 = memref.load %arg0[%c5_88, %c2_89] : memref<8x4xi32, #tpu.memory_space<smem>>
    %98 = arith.index_cast %97 : i32 to index
    %c0_90 = arith.constant 0 : index
    %c0_91 = arith.constant 0 : index
    %99 = vector.load %arg1[%98, %c0_90, %c0_91] : memref<50x1x128xf32, #tpu.memory_space<vmem>>, vector<1x1x128xf32>
    %100 = vector.shape_cast %99 : vector<1x1x128xf32> to vector<1x128xf32>
    %c5_92 = arith.constant 5 : index
    %c3_93 = arith.constant 3 : index
    %101 = memref.load %arg0[%c5_92, %c3_93] : memref<8x4xi32, #tpu.memory_space<smem>>
    %102 = arith.index_cast %101 : i32 to index
    %c0_94 = arith.constant 0 : index
    %c0_95 = arith.constant 0 : index
    %103 = vector.load %arg1[%102, %c0_94, %c0_95] : memref<50x1x128xf32, #tpu.memory_space<vmem>>, vector<1x1x128xf32>
    %104 = vector.shape_cast %103 : vector<1x1x128xf32> to vector<1x128xf32>
    %105 = tpu.concatenate %92, %96, %100, %104, %3 in 0 : vector<1x128xf32>, vector<1x128xf32>, vector<1x128xf32>, vector<1x128xf32>, vector<4x128xf32> -> vector<8x128xf32>
    %c6 = arith.constant 6 : index
    %c0_96 = arith.constant 0 : index
    %106 = memref.load %arg0[%c6, %c0_96] : memref<8x4xi32, #tpu.memory_space<smem>>
    %107 = arith.index_cast %106 : i32 to index
    %c0_97 = arith.constant 0 : index
    %c0_98 = arith.constant 0 : index
    %108 = vector.load %arg1[%107, %c0_97, %c0_98] : memref<50x1x128xf32, #tpu.memory_space<vmem>>, vector<1x1x128xf32>
    %109 = vector.shape_cast %108 : vector<1x1x128xf32> to vector<1x128xf32>
    %c6_99 = arith.constant 6 : index
    %c1_100 = arith.constant 1 : index
    %110 = memref.load %arg0[%c6_99, %c1_100] : memref<8x4xi32, #tpu.memory_space<smem>>
    %111 = arith.index_cast %110 : i32 to index
    %c0_101 = arith.constant 0 : index
    %c0_102 = arith.constant 0 : index
    %112 = vector.load %arg1[%111, %c0_101, %c0_102] : memref<50x1x128xf32, #tpu.memory_space<vmem>>, vector<1x1x128xf32>
    %113 = vector.shape_cast %112 : vector<1x1x128xf32> to vector<1x128xf32>
    %c6_103 = arith.constant 6 : index
    %c2_104 = arith.constant 2 : index
    %114 = memref.load %arg0[%c6_103, %c2_104] : memref<8x4xi32, #tpu.memory_space<smem>>
    %115 = arith.index_cast %114 : i32 to index
    %c0_105 = arith.constant 0 : index
    %c0_106 = arith.constant 0 : index
    %116 = vector.load %arg1[%115, %c0_105, %c0_106] : memref<50x1x128xf32, #tpu.memory_space<vmem>>, vector<1x1x128xf32>
    %117 = vector.shape_cast %116 : vector<1x1x128xf32> to vector<1x128xf32>
    %c6_107 = arith.constant 6 : index
    %c3_108 = arith.constant 3 : index
    %118 = memref.load %arg0[%c6_107, %c3_108] : memref<8x4xi32, #tpu.memory_space<smem>>
    %119 = arith.index_cast %118 : i32 to index
    %c0_109 = arith.constant 0 : index
    %c0_110 = arith.constant 0 : index
    %120 = vector.load %arg1[%119, %c0_109, %c0_110] : memref<50x1x128xf32, #tpu.memory_space<vmem>>, vector<1x1x128xf32>
    %121 = vector.shape_cast %120 : vector<1x1x128xf32> to vector<1x128xf32>
    %122 = tpu.concatenate %109, %113, %117, %121, %3 in 0 : vector<1x128xf32>, vector<1x128xf32>, vector<1x128xf32>, vector<1x128xf32>, vector<4x128xf32> -> vector<8x128xf32>
    %c7 = arith.constant 7 : index
    %c0_111 = arith.constant 0 : index
    %123 = memref.load %arg0[%c7, %c0_111] : memref<8x4xi32, #tpu.memory_space<smem>>
    %124 = arith.index_cast %123 : i32 to index
    %c0_112 = arith.constant 0 : index
    %c0_113 = arith.constant 0 : index
    %125 = vector.load %arg1[%124, %c0_112, %c0_113] : memref<50x1x128xf32, #tpu.memory_space<vmem>>, vector<1x1x128xf32>
    %126 = vector.shape_cast %125 : vector<1x1x128xf32> to vector<1x128xf32>
    %c7_114 = arith.constant 7 : index
    %c1_115 = arith.constant 1 : index
    %127 = memref.load %arg0[%c7_114, %c1_115] : memref<8x4xi32, #tpu.memory_space<smem>>
    %128 = arith.index_cast %127 : i32 to index
    %c0_116 = arith.constant 0 : index
    %c0_117 = arith.constant 0 : index
    %129 = vector.load %arg1[%128, %c0_116, %c0_117] : memref<50x1x128xf32, #tpu.memory_space<vmem>>, vector<1x1x128xf32>
    %130 = vector.shape_cast %129 : vector<1x1x128xf32> to vector<1x128xf32>
    %c7_118 = arith.constant 7 : index
    %c2_119 = arith.constant 2 : index
    %131 = memref.load %arg0[%c7_118, %c2_119] : memref<8x4xi32, #tpu.memory_space<smem>>
    %132 = arith.index_cast %131 : i32 to index
    %c0_120 = arith.constant 0 : index
    %c0_121 = arith.constant 0 : index
    %133 = vector.load %arg1[%132, %c0_120, %c0_121] : memref<50x1x128xf32, #tpu.memory_space<vmem>>, vector<1x1x128xf32>
    %134 = vector.shape_cast %133 : vector<1x1x128xf32> to vector<1x128xf32>
    %c7_122 = arith.constant 7 : index
    %c3_123 = arith.constant 3 : index
    %135 = memref.load %arg0[%c7_122, %c3_123] : memref<8x4xi32, #tpu.memory_space<smem>>
    %136 = arith.index_cast %135 : i32 to index
    %c0_124 = arith.constant 0 : index
    %c0_125 = arith.constant 0 : index
    %137 = vector.load %arg1[%136, %c0_124, %c0_125] : memref<50x1x128xf32, #tpu.memory_space<vmem>>, vector<1x1x128xf32>
    %138 = vector.shape_cast %137 : vector<1x1x128xf32> to vector<1x128xf32>
    %139 = tpu.concatenate %126, %130, %134, %138, %3 in 0 : vector<1x128xf32>, vector<1x128xf32>, vector<1x128xf32>, vector<1x128xf32>, vector<4x128xf32> -> vector<8x128xf32>
    %cst_126 = arith.constant 0.000000e+00 : f32
    %140 = vector.broadcast %cst_126 : f32 to vector<8x32xf32>
    %cst_127 = arith.constant 0.000000e+00 : f32
    %141 = vector.broadcast %cst_127 : f32 to vector<8x32xf32>
    %cst_128 = arith.constant 0.000000e+00 : f32
    %142 = vector.broadcast %cst_128 : f32 to vector<8x32xf32>
    %cst_129 = arith.constant 0.000000e+00 : f32
    %143 = vector.broadcast %cst_129 : f32 to vector<8x32xf32>
    %cst_130 = arith.constant dense<0.000000e+00> : vector<8x128xf32>
    %144 = tpu.matmul %140, %0, %cst_130 {dimension_numbers = #tpu.dot_dimension_numbers<[1], [0], [0], [1], [0, 0, 1, 1], [], []>} : vector<8x32xf32>, vector<32x128xf32>, vector<8x128xf32> -> vector<8x128xf32>
    %145 = arith.addf %20, %144 : vector<8x128xf32>
    %146 = arith.negf %145 : vector<8x128xf32>
    %147 = math.exp %146 : vector<8x128xf32>
    %cst_131 = arith.constant 1.000000e+00 : f32
    %148 = vector.broadcast %cst_131 : f32 to vector<8x128xf32>
    %149 = arith.addf %148, %147 : vector<8x128xf32>
    %150 = arith.divf %148, %149 : vector<8x128xf32>
    %151 = math.tanh %145 : vector<8x128xf32>
    %152 = vector.extract_strided_slice %150 {offsets = [0, 0], sizes = [8, 32], strides = [1, 1]} : vector<8x128xf32> to vector<8x32xf32>
    %153 = vector.extract_strided_slice %150 {offsets = [0, 32], sizes = [8, 32], strides = [1, 1]} : vector<8x128xf32> to vector<8x32xf32>
    %154 = vector.extract_strided_slice %151 {offsets = [0, 64], sizes = [8, 32], strides = [1, 1]} : vector<8x128xf32> to vector<8x32xf32>
    %155 = vector.extract_strided_slice %150 {offsets = [0, 96], sizes = [8, 32], strides = [1, 1]} : vector<8x128xf32> to vector<8x32xf32>
    %156 = arith.mulf %153, %141 : vector<8x32xf32>
    %157 = arith.mulf %152, %154 : vector<8x32xf32>
    %158 = arith.addf %156, %157 : vector<8x32xf32>
    %159 = math.tanh %158 : vector<8x32xf32>
    %160 = arith.mulf %155, %159 : vector<8x32xf32>
    %161 = tpu.concatenate %160, %142 in 1 : vector<8x32xf32>, vector<8x32xf32> -> vector<8x64xf32>
    %cst_132 = arith.constant dense<0.000000e+00> : vector<8x128xf32>
    %162 = tpu.matmul %161, %1, %cst_132 {dimension_numbers = #tpu.dot_dimension_numbers<[1], [0], [0], [1], [0, 0, 1, 1], [], []>} : vector<8x64xf32>, vector<64x128xf32>, vector<8x128xf32> -> vector<8x128xf32>
    %163 = vector.broadcast %2 : vector<1x128xf32> to vector<8x128xf32>
    %164 = arith.addf %162, %163 : vector<8x128xf32>
    %165 = arith.negf %164 : vector<8x128xf32>
    %166 = math.exp %165 : vector<8x128xf32>
    %cst_133 = arith.constant 1.000000e+00 : f32
    %167 = vector.broadcast %cst_133 : f32 to vector<8x128xf32>
    %168 = arith.addf %167, %166 : vector<8x128xf32>
    %169 = arith.divf %167, %168 : vector<8x128xf32>
    %170 = math.tanh %164 : vector<8x128xf32>
    %171 = vector.extract_strided_slice %169 {offsets = [0, 0], sizes = [8, 32], strides = [1, 1]} : vector<8x128xf32> to vector<8x32xf32>
    %172 = vector.extract_strided_slice %169 {offsets = [0, 32], sizes = [8, 32], strides = [1, 1]} : vector<8x128xf32> to vector<8x32xf32>
    %173 = vector.extract_strided_slice %170 {offsets = [0, 64], sizes = [8, 32], strides = [1, 1]} : vector<8x128xf32> to vector<8x32xf32>
    %174 = vector.extract_strided_slice %169 {offsets = [0, 96], sizes = [8, 32], strides = [1, 1]} : vector<8x128xf32> to vector<8x32xf32>
    %175 = arith.mulf %172, %143 : vector<8x32xf32>
    %176 = arith.mulf %171, %173 : vector<8x32xf32>
    %177 = arith.addf %175, %176 : vector<8x32xf32>
    %178 = math.tanh %177 : vector<8x32xf32>
    %179 = arith.mulf %174, %178 : vector<8x32xf32>
    %cst_134 = arith.constant dense<0.000000e+00> : vector<8x128xf32>
    %180 = tpu.matmul %160, %0, %cst_134 {dimension_numbers = #tpu.dot_dimension_numbers<[1], [0], [0], [1], [0, 0, 1, 1], [], []>} : vector<8x32xf32>, vector<32x128xf32>, vector<8x128xf32> -> vector<8x128xf32>
    %181 = arith.addf %37, %180 : vector<8x128xf32>
    %182 = arith.negf %181 : vector<8x128xf32>
    %183 = math.exp %182 : vector<8x128xf32>
    %cst_135 = arith.constant 1.000000e+00 : f32
    %184 = vector.broadcast %cst_135 : f32 to vector<8x128xf32>
    %185 = arith.addf %184, %183 : vector<8x128xf32>
    %186 = arith.divf %184, %185 : vector<8x128xf32>
    %187 = math.tanh %181 : vector<8x128xf32>
    %188 = vector.extract_strided_slice %186 {offsets = [0, 0], sizes = [8, 32], strides = [1, 1]} : vector<8x128xf32> to vector<8x32xf32>
    %189 = vector.extract_strided_slice %186 {offsets = [0, 32], sizes = [8, 32], strides = [1, 1]} : vector<8x128xf32> to vector<8x32xf32>
    %190 = vector.extract_strided_slice %187 {offsets = [0, 64], sizes = [8, 32], strides = [1, 1]} : vector<8x128xf32> to vector<8x32xf32>
    %191 = vector.extract_strided_slice %186 {offsets = [0, 96], sizes = [8, 32], strides = [1, 1]} : vector<8x128xf32> to vector<8x32xf32>
    %192 = arith.mulf %189, %158 : vector<8x32xf32>
    %193 = arith.mulf %188, %190 : vector<8x32xf32>
    %194 = arith.addf %192, %193 : vector<8x32xf32>
    %195 = math.tanh %194 : vector<8x32xf32>
    %196 = arith.mulf %191, %195 : vector<8x32xf32>
    %197 = tpu.concatenate %196, %179 in 1 : vector<8x32xf32>, vector<8x32xf32> -> vector<8x64xf32>
    %cst_136 = arith.constant dense<0.000000e+00> : vector<8x128xf32>
    %198 = tpu.matmul %197, %1, %cst_136 {dimension_numbers = #tpu.dot_dimension_numbers<[1], [0], [0], [1], [0, 0, 1, 1], [], []>} : vector<8x64xf32>, vector<64x128xf32>, vector<8x128xf32> -> vector<8x128xf32>
    %199 = vector.broadcast %2 : vector<1x128xf32> to vector<8x128xf32>
    %200 = arith.addf %198, %199 : vector<8x128xf32>
    %201 = arith.negf %200 : vector<8x128xf32>
    %202 = math.exp %201 : vector<8x128xf32>
    %cst_137 = arith.constant 1.000000e+00 : f32
    %203 = vector.broadcast %cst_137 : f32 to vector<8x128xf32>
    %204 = arith.addf %203, %202 : vector<8x128xf32>
    %205 = arith.divf %203, %204 : vector<8x128xf32>
    %206 = math.tanh %200 : vector<8x128xf32>
    %207 = vector.extract_strided_slice %205 {offsets = [0, 0], sizes = [8, 32], strides = [1, 1]} : vector<8x128xf32> to vector<8x32xf32>
    %208 = vector.extract_strided_slice %205 {offsets = [0, 32], sizes = [8, 32], strides = [1, 1]} : vector<8x128xf32> to vector<8x32xf32>
    %209 = vector.extract_strided_slice %206 {offsets = [0, 64], sizes = [8, 32], strides = [1, 1]} : vector<8x128xf32> to vector<8x32xf32>
    %210 = vector.extract_strided_slice %205 {offsets = [0, 96], sizes = [8, 32], strides = [1, 1]} : vector<8x128xf32> to vector<8x32xf32>
    %211 = arith.mulf %208, %177 : vector<8x32xf32>
    %212 = arith.mulf %207, %209 : vector<8x32xf32>
    %213 = arith.addf %211, %212 : vector<8x32xf32>
    %214 = math.tanh %213 : vector<8x32xf32>
    %215 = arith.mulf %210, %214 : vector<8x32xf32>
    %cst_138 = arith.constant dense<0.000000e+00> : vector<8x128xf32>
    %216 = tpu.matmul %196, %0, %cst_138 {dimension_numbers = #tpu.dot_dimension_numbers<[1], [0], [0], [1], [0, 0, 1, 1], [], []>} : vector<8x32xf32>, vector<32x128xf32>, vector<8x128xf32> -> vector<8x128xf32>
    %217 = arith.addf %54, %216 : vector<8x128xf32>
    %218 = arith.negf %217 : vector<8x128xf32>
    %219 = math.exp %218 : vector<8x128xf32>
    %cst_139 = arith.constant 1.000000e+00 : f32
    %220 = vector.broadcast %cst_139 : f32 to vector<8x128xf32>
    %221 = arith.addf %220, %219 : vector<8x128xf32>
    %222 = arith.divf %220, %221 : vector<8x128xf32>
    %223 = math.tanh %217 : vector<8x128xf32>
    %224 = vector.extract_strided_slice %222 {offsets = [0, 0], sizes = [8, 32], strides = [1, 1]} : vector<8x128xf32> to vector<8x32xf32>
    %225 = vector.extract_strided_slice %222 {offsets = [0, 32], sizes = [8, 32], strides = [1, 1]} : vector<8x128xf32> to vector<8x32xf32>
    %226 = vector.extract_strided_slice %223 {offsets = [0, 64], sizes = [8, 32], strides = [1, 1]} : vector<8x128xf32> to vector<8x32xf32>
    %227 = vector.extract_strided_slice %222 {offsets = [0, 96], sizes = [8, 32], strides = [1, 1]} : vector<8x128xf32> to vector<8x32xf32>
    %228 = arith.mulf %225, %194 : vector<8x32xf32>
    %229 = arith.mulf %224, %226 : vector<8x32xf32>
    %230 = arith.addf %228, %229 : vector<8x32xf32>
    %231 = math.tanh %230 : vector<8x32xf32>
    %232 = arith.mulf %227, %231 : vector<8x32xf32>
    %233 = tpu.concatenate %232, %215 in 1 : vector<8x32xf32>, vector<8x32xf32> -> vector<8x64xf32>
    %cst_140 = arith.constant dense<0.000000e+00> : vector<8x128xf32>
    %234 = tpu.matmul %233, %1, %cst_140 {dimension_numbers = #tpu.dot_dimension_numbers<[1], [0], [0], [1], [0, 0, 1, 1], [], []>} : vector<8x64xf32>, vector<64x128xf32>, vector<8x128xf32> -> vector<8x128xf32>
    %235 = vector.broadcast %2 : vector<1x128xf32> to vector<8x128xf32>
    %236 = arith.addf %234, %235 : vector<8x128xf32>
    %237 = arith.negf %236 : vector<8x128xf32>
    %238 = math.exp %237 : vector<8x128xf32>
    %cst_141 = arith.constant 1.000000e+00 : f32
    %239 = vector.broadcast %cst_141 : f32 to vector<8x128xf32>
    %240 = arith.addf %239, %238 : vector<8x128xf32>
    %241 = arith.divf %239, %240 : vector<8x128xf32>
    %242 = math.tanh %236 : vector<8x128xf32>
    %243 = vector.extract_strided_slice %241 {offsets = [0, 0], sizes = [8, 32], strides = [1, 1]} : vector<8x128xf32> to vector<8x32xf32>
    %244 = vector.extract_strided_slice %241 {offsets = [0, 32], sizes = [8, 32], strides = [1, 1]} : vector<8x128xf32> to vector<8x32xf32>
    %245 = vector.extract_strided_slice %242 {offsets = [0, 64], sizes = [8, 32], strides = [1, 1]} : vector<8x128xf32> to vector<8x32xf32>
    %246 = vector.extract_strided_slice %241 {offsets = [0, 96], sizes = [8, 32], strides = [1, 1]} : vector<8x128xf32> to vector<8x32xf32>
    %247 = arith.mulf %244, %213 : vector<8x32xf32>
    %248 = arith.mulf %243, %245 : vector<8x32xf32>
    %249 = arith.addf %247, %248 : vector<8x32xf32>
    %250 = math.tanh %249 : vector<8x32xf32>
    %251 = arith.mulf %246, %250 : vector<8x32xf32>
    %cst_142 = arith.constant dense<0.000000e+00> : vector<8x128xf32>
    %252 = tpu.matmul %232, %0, %cst_142 {dimension_numbers = #tpu.dot_dimension_numbers<[1], [0], [0], [1], [0, 0, 1, 1], [], []>} : vector<8x32xf32>, vector<32x128xf32>, vector<8x128xf32> -> vector<8x128xf32>
    %253 = arith.addf %71, %252 : vector<8x128xf32>
    %254 = arith.negf %253 : vector<8x128xf32>
    %255 = math.exp %254 : vector<8x128xf32>
    %cst_143 = arith.constant 1.000000e+00 : f32
    %256 = vector.broadcast %cst_143 : f32 to vector<8x128xf32>
    %257 = arith.addf %256, %255 : vector<8x128xf32>
    %258 = arith.divf %256, %257 : vector<8x128xf32>
    %259 = math.tanh %253 : vector<8x128xf32>
    %260 = vector.extract_strided_slice %258 {offsets = [0, 0], sizes = [8, 32], strides = [1, 1]} : vector<8x128xf32> to vector<8x32xf32>
    %261 = vector.extract_strided_slice %258 {offsets = [0, 32], sizes = [8, 32], strides = [1, 1]} : vector<8x128xf32> to vector<8x32xf32>
    %262 = vector.extract_strided_slice %259 {offsets = [0, 64], sizes = [8, 32], strides = [1, 1]} : vector<8x128xf32> to vector<8x32xf32>
    %263 = vector.extract_strided_slice %258 {offsets = [0, 96], sizes = [8, 32], strides = [1, 1]} : vector<8x128xf32> to vector<8x32xf32>
    %264 = arith.mulf %261, %230 : vector<8x32xf32>
    %265 = arith.mulf %260, %262 : vector<8x32xf32>
    %266 = arith.addf %264, %265 : vector<8x32xf32>
    %267 = math.tanh %266 : vector<8x32xf32>
    %268 = arith.mulf %263, %267 : vector<8x32xf32>
    %269 = tpu.concatenate %268, %251 in 1 : vector<8x32xf32>, vector<8x32xf32> -> vector<8x64xf32>
    %cst_144 = arith.constant dense<0.000000e+00> : vector<8x128xf32>
    %270 = tpu.matmul %269, %1, %cst_144 {dimension_numbers = #tpu.dot_dimension_numbers<[1], [0], [0], [1], [0, 0, 1, 1], [], []>} : vector<8x64xf32>, vector<64x128xf32>, vector<8x128xf32> -> vector<8x128xf32>
    %271 = vector.broadcast %2 : vector<1x128xf32> to vector<8x128xf32>
    %272 = arith.addf %270, %271 : vector<8x128xf32>
    %273 = arith.negf %272 : vector<8x128xf32>
    %274 = math.exp %273 : vector<8x128xf32>
    %cst_145 = arith.constant 1.000000e+00 : f32
    %275 = vector.broadcast %cst_145 : f32 to vector<8x128xf32>
    %276 = arith.addf %275, %274 : vector<8x128xf32>
    %277 = arith.divf %275, %276 : vector<8x128xf32>
    %278 = math.tanh %272 : vector<8x128xf32>
    %279 = vector.extract_strided_slice %277 {offsets = [0, 0], sizes = [8, 32], strides = [1, 1]} : vector<8x128xf32> to vector<8x32xf32>
    %280 = vector.extract_strided_slice %277 {offsets = [0, 32], sizes = [8, 32], strides = [1, 1]} : vector<8x128xf32> to vector<8x32xf32>
    %281 = vector.extract_strided_slice %278 {offsets = [0, 64], sizes = [8, 32], strides = [1, 1]} : vector<8x128xf32> to vector<8x32xf32>
    %282 = vector.extract_strided_slice %277 {offsets = [0, 96], sizes = [8, 32], strides = [1, 1]} : vector<8x128xf32> to vector<8x32xf32>
    %283 = arith.mulf %280, %249 : vector<8x32xf32>
    %284 = arith.mulf %279, %281 : vector<8x32xf32>
    %285 = arith.addf %283, %284 : vector<8x32xf32>
    %286 = math.tanh %285 : vector<8x32xf32>
    %287 = arith.mulf %282, %286 : vector<8x32xf32>
    %cst_146 = arith.constant dense<0.000000e+00> : vector<8x128xf32>
    %288 = tpu.matmul %268, %0, %cst_146 {dimension_numbers = #tpu.dot_dimension_numbers<[1], [0], [0], [1], [0, 0, 1, 1], [], []>} : vector<8x32xf32>, vector<32x128xf32>, vector<8x128xf32> -> vector<8x128xf32>
    %289 = arith.addf %88, %288 : vector<8x128xf32>
    %290 = arith.negf %289 : vector<8x128xf32>
    %291 = math.exp %290 : vector<8x128xf32>
    %cst_147 = arith.constant 1.000000e+00 : f32
    %292 = vector.broadcast %cst_147 : f32 to vector<8x128xf32>
    %293 = arith.addf %292, %291 : vector<8x128xf32>
    %294 = arith.divf %292, %293 : vector<8x128xf32>
    %295 = math.tanh %289 : vector<8x128xf32>
    %296 = vector.extract_strided_slice %294 {offsets = [0, 0], sizes = [8, 32], strides = [1, 1]} : vector<8x128xf32> to vector<8x32xf32>
    %297 = vector.extract_strided_slice %294 {offsets = [0, 32], sizes = [8, 32], strides = [1, 1]} : vector<8x128xf32> to vector<8x32xf32>
    %298 = vector.extract_strided_slice %295 {offsets = [0, 64], sizes = [8, 32], strides = [1, 1]} : vector<8x128xf32> to vector<8x32xf32>
    %299 = vector.extract_strided_slice %294 {offsets = [0, 96], sizes = [8, 32], strides = [1, 1]} : vector<8x128xf32> to vector<8x32xf32>
    %300 = arith.mulf %297, %266 : vector<8x32xf32>
    %301 = arith.mulf %296, %298 : vector<8x32xf32>
    %302 = arith.addf %300, %301 : vector<8x32xf32>
    %303 = math.tanh %302 : vector<8x32xf32>
    %304 = arith.mulf %299, %303 : vector<8x32xf32>
    %305 = tpu.concatenate %304, %287 in 1 : vector<8x32xf32>, vector<8x32xf32> -> vector<8x64xf32>
    %cst_148 = arith.constant dense<0.000000e+00> : vector<8x128xf32>
    %306 = tpu.matmul %305, %1, %cst_148 {dimension_numbers = #tpu.dot_dimension_numbers<[1], [0], [0], [1], [0, 0, 1, 1], [], []>} : vector<8x64xf32>, vector<64x128xf32>, vector<8x128xf32> -> vector<8x128xf32>
    %307 = vector.broadcast %2 : vector<1x128xf32> to vector<8x128xf32>
    %308 = arith.addf %306, %307 : vector<8x128xf32>
    %309 = arith.negf %308 : vector<8x128xf32>
    %310 = math.exp %309 : vector<8x128xf32>
    %cst_149 = arith.constant 1.000000e+00 : f32
    %311 = vector.broadcast %cst_149 : f32 to vector<8x128xf32>
    %312 = arith.addf %311, %310 : vector<8x128xf32>
    %313 = arith.divf %311, %312 : vector<8x128xf32>
    %314 = math.tanh %308 : vector<8x128xf32>
    %315 = vector.extract_strided_slice %313 {offsets = [0, 0], sizes = [8, 32], strides = [1, 1]} : vector<8x128xf32> to vector<8x32xf32>
    %316 = vector.extract_strided_slice %313 {offsets = [0, 32], sizes = [8, 32], strides = [1, 1]} : vector<8x128xf32> to vector<8x32xf32>
    %317 = vector.extract_strided_slice %314 {offsets = [0, 64], sizes = [8, 32], strides = [1, 1]} : vector<8x128xf32> to vector<8x32xf32>
    %318 = vector.extract_strided_slice %313 {offsets = [0, 96], sizes = [8, 32], strides = [1, 1]} : vector<8x128xf32> to vector<8x32xf32>
    %319 = arith.mulf %316, %285 : vector<8x32xf32>
    %320 = arith.mulf %315, %317 : vector<8x32xf32>
    %321 = arith.addf %319, %320 : vector<8x32xf32>
    %322 = math.tanh %321 : vector<8x32xf32>
    %323 = arith.mulf %318, %322 : vector<8x32xf32>
    %cst_150 = arith.constant dense<0.000000e+00> : vector<8x128xf32>
    %324 = tpu.matmul %304, %0, %cst_150 {dimension_numbers = #tpu.dot_dimension_numbers<[1], [0], [0], [1], [0, 0, 1, 1], [], []>} : vector<8x32xf32>, vector<32x128xf32>, vector<8x128xf32> -> vector<8x128xf32>
    %325 = arith.addf %105, %324 : vector<8x128xf32>
    %326 = arith.negf %325 : vector<8x128xf32>
    %327 = math.exp %326 : vector<8x128xf32>
    %cst_151 = arith.constant 1.000000e+00 : f32
    %328 = vector.broadcast %cst_151 : f32 to vector<8x128xf32>
    %329 = arith.addf %328, %327 : vector<8x128xf32>
    %330 = arith.divf %328, %329 : vector<8x128xf32>
    %331 = math.tanh %325 : vector<8x128xf32>
    %332 = vector.extract_strided_slice %330 {offsets = [0, 0], sizes = [8, 32], strides = [1, 1]} : vector<8x128xf32> to vector<8x32xf32>
    %333 = vector.extract_strided_slice %330 {offsets = [0, 32], sizes = [8, 32], strides = [1, 1]} : vector<8x128xf32> to vector<8x32xf32>
    %334 = vector.extract_strided_slice %331 {offsets = [0, 64], sizes = [8, 32], strides = [1, 1]} : vector<8x128xf32> to vector<8x32xf32>
    %335 = vector.extract_strided_slice %330 {offsets = [0, 96], sizes = [8, 32], strides = [1, 1]} : vector<8x128xf32> to vector<8x32xf32>
    %336 = arith.mulf %333, %302 : vector<8x32xf32>
    %337 = arith.mulf %332, %334 : vector<8x32xf32>
    %338 = arith.addf %336, %337 : vector<8x32xf32>
    %339 = math.tanh %338 : vector<8x32xf32>
    %340 = arith.mulf %335, %339 : vector<8x32xf32>
    %341 = tpu.concatenate %340, %323 in 1 : vector<8x32xf32>, vector<8x32xf32> -> vector<8x64xf32>
    %cst_152 = arith.constant dense<0.000000e+00> : vector<8x128xf32>
    %342 = tpu.matmul %341, %1, %cst_152 {dimension_numbers = #tpu.dot_dimension_numbers<[1], [0], [0], [1], [0, 0, 1, 1], [], []>} : vector<8x64xf32>, vector<64x128xf32>, vector<8x128xf32> -> vector<8x128xf32>
    %343 = vector.broadcast %2 : vector<1x128xf32> to vector<8x128xf32>
    %344 = arith.addf %342, %343 : vector<8x128xf32>
    %345 = arith.negf %344 : vector<8x128xf32>
    %346 = math.exp %345 : vector<8x128xf32>
    %cst_153 = arith.constant 1.000000e+00 : f32
    %347 = vector.broadcast %cst_153 : f32 to vector<8x128xf32>
    %348 = arith.addf %347, %346 : vector<8x128xf32>
    %349 = arith.divf %347, %348 : vector<8x128xf32>
    %350 = math.tanh %344 : vector<8x128xf32>
    %351 = vector.extract_strided_slice %349 {offsets = [0, 0], sizes = [8, 32], strides = [1, 1]} : vector<8x128xf32> to vector<8x32xf32>
    %352 = vector.extract_strided_slice %349 {offsets = [0, 32], sizes = [8, 32], strides = [1, 1]} : vector<8x128xf32> to vector<8x32xf32>
    %353 = vector.extract_strided_slice %350 {offsets = [0, 64], sizes = [8, 32], strides = [1, 1]} : vector<8x128xf32> to vector<8x32xf32>
    %354 = vector.extract_strided_slice %349 {offsets = [0, 96], sizes = [8, 32], strides = [1, 1]} : vector<8x128xf32> to vector<8x32xf32>
    %355 = arith.mulf %352, %321 : vector<8x32xf32>
    %356 = arith.mulf %351, %353 : vector<8x32xf32>
    %357 = arith.addf %355, %356 : vector<8x32xf32>
    %358 = math.tanh %357 : vector<8x32xf32>
    %359 = arith.mulf %354, %358 : vector<8x32xf32>
    %cst_154 = arith.constant dense<0.000000e+00> : vector<8x128xf32>
    %360 = tpu.matmul %340, %0, %cst_154 {dimension_numbers = #tpu.dot_dimension_numbers<[1], [0], [0], [1], [0, 0, 1, 1], [], []>} : vector<8x32xf32>, vector<32x128xf32>, vector<8x128xf32> -> vector<8x128xf32>
    %361 = arith.addf %122, %360 : vector<8x128xf32>
    %362 = arith.negf %361 : vector<8x128xf32>
    %363 = math.exp %362 : vector<8x128xf32>
    %cst_155 = arith.constant 1.000000e+00 : f32
    %364 = vector.broadcast %cst_155 : f32 to vector<8x128xf32>
    %365 = arith.addf %364, %363 : vector<8x128xf32>
    %366 = arith.divf %364, %365 : vector<8x128xf32>
    %367 = math.tanh %361 : vector<8x128xf32>
    %368 = vector.extract_strided_slice %366 {offsets = [0, 0], sizes = [8, 32], strides = [1, 1]} : vector<8x128xf32> to vector<8x32xf32>
    %369 = vector.extract_strided_slice %366 {offsets = [0, 32], sizes = [8, 32], strides = [1, 1]} : vector<8x128xf32> to vector<8x32xf32>
    %370 = vector.extract_strided_slice %367 {offsets = [0, 64], sizes = [8, 32], strides = [1, 1]} : vector<8x128xf32> to vector<8x32xf32>
    %371 = vector.extract_strided_slice %366 {offsets = [0, 96], sizes = [8, 32], strides = [1, 1]} : vector<8x128xf32> to vector<8x32xf32>
    %372 = arith.mulf %369, %338 : vector<8x32xf32>
    %373 = arith.mulf %368, %370 : vector<8x32xf32>
    %374 = arith.addf %372, %373 : vector<8x32xf32>
    %375 = math.tanh %374 : vector<8x32xf32>
    %376 = arith.mulf %371, %375 : vector<8x32xf32>
    %377 = tpu.concatenate %376, %359 in 1 : vector<8x32xf32>, vector<8x32xf32> -> vector<8x64xf32>
    %cst_156 = arith.constant dense<0.000000e+00> : vector<8x128xf32>
    %378 = tpu.matmul %377, %1, %cst_156 {dimension_numbers = #tpu.dot_dimension_numbers<[1], [0], [0], [1], [0, 0, 1, 1], [], []>} : vector<8x64xf32>, vector<64x128xf32>, vector<8x128xf32> -> vector<8x128xf32>
    %379 = vector.broadcast %2 : vector<1x128xf32> to vector<8x128xf32>
    %380 = arith.addf %378, %379 : vector<8x128xf32>
    %381 = arith.negf %380 : vector<8x128xf32>
    %382 = math.exp %381 : vector<8x128xf32>
    %cst_157 = arith.constant 1.000000e+00 : f32
    %383 = vector.broadcast %cst_157 : f32 to vector<8x128xf32>
    %384 = arith.addf %383, %382 : vector<8x128xf32>
    %385 = arith.divf %383, %384 : vector<8x128xf32>
    %386 = math.tanh %380 : vector<8x128xf32>
    %387 = vector.extract_strided_slice %385 {offsets = [0, 0], sizes = [8, 32], strides = [1, 1]} : vector<8x128xf32> to vector<8x32xf32>
    %388 = vector.extract_strided_slice %385 {offsets = [0, 32], sizes = [8, 32], strides = [1, 1]} : vector<8x128xf32> to vector<8x32xf32>
    %389 = vector.extract_strided_slice %386 {offsets = [0, 64], sizes = [8, 32], strides = [1, 1]} : vector<8x128xf32> to vector<8x32xf32>
    %390 = vector.extract_strided_slice %385 {offsets = [0, 96], sizes = [8, 32], strides = [1, 1]} : vector<8x128xf32> to vector<8x32xf32>
    %391 = arith.mulf %388, %357 : vector<8x32xf32>
    %392 = arith.mulf %387, %389 : vector<8x32xf32>
    %393 = arith.addf %391, %392 : vector<8x32xf32>
    %394 = math.tanh %393 : vector<8x32xf32>
    %395 = arith.mulf %390, %394 : vector<8x32xf32>
    %cst_158 = arith.constant dense<0.000000e+00> : vector<8x128xf32>
    %396 = tpu.matmul %376, %0, %cst_158 {dimension_numbers = #tpu.dot_dimension_numbers<[1], [0], [0], [1], [0, 0, 1, 1], [], []>} : vector<8x32xf32>, vector<32x128xf32>, vector<8x128xf32> -> vector<8x128xf32>
    %397 = arith.addf %139, %396 : vector<8x128xf32>
    %398 = arith.negf %397 : vector<8x128xf32>
    %399 = math.exp %398 : vector<8x128xf32>
    %cst_159 = arith.constant 1.000000e+00 : f32
    %400 = vector.broadcast %cst_159 : f32 to vector<8x128xf32>
    %401 = arith.addf %400, %399 : vector<8x128xf32>
    %402 = arith.divf %400, %401 : vector<8x128xf32>
    %403 = math.tanh %397 : vector<8x128xf32>
    %404 = vector.extract_strided_slice %402 {offsets = [0, 0], sizes = [8, 32], strides = [1, 1]} : vector<8x128xf32> to vector<8x32xf32>
    %405 = vector.extract_strided_slice %402 {offsets = [0, 32], sizes = [8, 32], strides = [1, 1]} : vector<8x128xf32> to vector<8x32xf32>
    %406 = vector.extract_strided_slice %403 {offsets = [0, 64], sizes = [8, 32], strides = [1, 1]} : vector<8x128xf32> to vector<8x32xf32>
    %407 = vector.extract_strided_slice %402 {offsets = [0, 96], sizes = [8, 32], strides = [1, 1]} : vector<8x128xf32> to vector<8x32xf32>
    %408 = arith.mulf %405, %374 : vector<8x32xf32>
    %409 = arith.mulf %404, %406 : vector<8x32xf32>
    %410 = arith.addf %408, %409 : vector<8x32xf32>
    %411 = math.tanh %410 : vector<8x32xf32>
    %412 = arith.mulf %407, %411 : vector<8x32xf32>
    %413 = tpu.concatenate %412, %395 in 1 : vector<8x32xf32>, vector<8x32xf32> -> vector<8x64xf32>
    %cst_160 = arith.constant dense<0.000000e+00> : vector<8x128xf32>
    %414 = tpu.matmul %413, %1, %cst_160 {dimension_numbers = #tpu.dot_dimension_numbers<[1], [0], [0], [1], [0, 0, 1, 1], [], []>} : vector<8x64xf32>, vector<64x128xf32>, vector<8x128xf32> -> vector<8x128xf32>
    %415 = vector.broadcast %2 : vector<1x128xf32> to vector<8x128xf32>
    %416 = arith.addf %414, %415 : vector<8x128xf32>
    %417 = arith.negf %416 : vector<8x128xf32>
    %418 = math.exp %417 : vector<8x128xf32>
    %cst_161 = arith.constant 1.000000e+00 : f32
    %419 = vector.broadcast %cst_161 : f32 to vector<8x128xf32>
    %420 = arith.addf %419, %418 : vector<8x128xf32>
    %421 = arith.divf %419, %420 : vector<8x128xf32>
    %422 = math.tanh %416 : vector<8x128xf32>
    %423 = vector.extract_strided_slice %421 {offsets = [0, 0], sizes = [8, 32], strides = [1, 1]} : vector<8x128xf32> to vector<8x32xf32>
    %424 = vector.extract_strided_slice %421 {offsets = [0, 32], sizes = [8, 32], strides = [1, 1]} : vector<8x128xf32> to vector<8x32xf32>
    %425 = vector.extract_strided_slice %422 {offsets = [0, 64], sizes = [8, 32], strides = [1, 1]} : vector<8x128xf32> to vector<8x32xf32>
    %426 = vector.extract_strided_slice %421 {offsets = [0, 96], sizes = [8, 32], strides = [1, 1]} : vector<8x128xf32> to vector<8x32xf32>
    %427 = arith.mulf %424, %393 : vector<8x32xf32>
    %428 = arith.mulf %423, %425 : vector<8x32xf32>
    %429 = arith.addf %427, %428 : vector<8x32xf32>
    %430 = math.tanh %429 : vector<8x32xf32>
    %431 = arith.mulf %426, %430 : vector<8x32xf32>
    %432 = tpu.concatenate %412, %431, %410, %429 in 1 : vector<8x32xf32>, vector<8x32xf32>, vector<8x32xf32>, vector<8x32xf32> -> vector<8x128xf32>
    %c0_162 = arith.constant 0 : index
    %c0_163 = arith.constant 0 : index
    %433 = vector.load %arg5[%c0_162, %c0_163] : memref<8x128xf32, #tpu.memory_space<vmem>>, vector<8x128xf32>
    tpu.vector_store %arg5[%c0_162, %c0_163], %432 {strides = array<i32>} : memref<8x128xf32, #tpu.memory_space<vmem>>, vector<8x128xf32>,
    return
  }
}

</mosaic_0001>

<bundles_post_ra>
// kernel: encoder_forward.1
= control target key start
LH: loop header
LB: loop body
LE: loop exit
PB: predicated region body
PF: predicated region fallthrough
CT: control target
= control target key end

     0   :  { %10 = vsyncpa [#allocation4], 0  ;;  %s2094_s0 = inlined_call_operand.vmem [shape: s32[8,4], index: 0, kind: input, shape index: {}]   ;;  %s2095_s1 = inlined_call_operand.hbm [shape: f32[50,1,128], index: 1, kind: input, shape index: {}]   ;;  %s2096_s2 = inlined_call_operand.hbm [shape: f32[32,128], index: 2, kind: input, shape index: {}]   ;;  %s2097_s3 = inlined_call_operand.hbm [shape: f32[64,128], index: 3, kind: input, shape index: {}]   ;;  %s2098_s4 = inlined_call_operand.vmem [shape: f32[1,128], index: 4, kind: input, shape index: {}]   ;;  %s2099_s5 = inlined_call_operand.vmem [shape: f32[8,128], index: 5, kind: output, shape index: {}]  }
   0x1   :  { %11 = vsyncpa [#allocation3], 0 }
   0x2   :  { %12 = vsyncpa [#allocation7], 0  ;;  %s39_s20 = sshll.u32 %s2096_s2, 4  ;;  %s1704_s21 = smov [#allocation6]   ;;  %s40_s20 = int_to_ptr.hbm [resolvable:$true] %s39_s20 }
   0x3   :  { %s41_s22 = sshll.u32 %s1704_s21, 4  ;;  %s18_s25 = sshll.u32 %s2094_s0, 4  ;;  %s42_s22 = int_to_ptr.vmem [resolvable:$true] %s41_s22  ;;  %s19_s25 = int_to_ptr.vmem [resolvable:$true] %s18_s25 }
   0x4   :  { %s1705_s26 = smov 128   ;;  %s1706_s27 = smov 8  }
   0x5   :  { %47 = dma.hbm_to_vmem [thread:$0]  %s40_s20, 512, %s42_s22, [#allocation7], %s1705_s26, %s1705_s26, %s1706_s27  }
   0x6   :  { %s1707_s28 = smov [#allocation2]   ;;  %s26_s6 = sshll.u32 %s2095_s1, 4  ;;  %s27_s6 = int_to_ptr.hbm [resolvable:$true] %s26_s6 }
   0x7   :  { %21 = dma.vmem_to_smem %s19_s25, 128, %s1707_s28, [#allocation4]  }
   0x8   :  { %s1708_s2 = smov [#allocation5]   ;;  %s52_s10 = sshll.u32 %s2097_s3, 4  ;;  %s53_s10 = int_to_ptr.hbm [resolvable:$true] %s52_s10 }
   0x9   :  { %s28_s7 = sshll.u32 %s1708_s2, 4  ;;  %s1709_s11 = smov 16   ;;  %s29_s7 = int_to_ptr.vmem [resolvable:$true] %s28_s7 }
   0xa   :  { %s1710_s0 = smov 1   ;;  %s1711_s12 = smov [#allocation8]  }
   0xb   :  { %34 = dma.hbm_to_vmem [thread:$0]  %s27_s6, 800, %s29_s7, [#allocation3], %s1709_s11, %s1709_s11, %s1710_s0  }
   0xc   :  { %s54_s13 = sshll.u32 %s1711_s12, 4  ;;  %s55_s13 = int_to_ptr.vmem [resolvable:$true] %s54_s13 }
   0xd   :  { %60 = dma.hbm_to_vmem [thread:$0]  %s53_s10, 1024, %s55_s13, [#allocation7], %s1705_s26, %s1705_s26, %s1706_s27  }
   0xe   :  { %1698 = dma.done.wait [#allocation4], 128  }
   0xf   :  { %1699 = vsyncadd [#allocation4], 4294967168 }
  0x10   :  { %1700 = dma.done.wait [#allocation3], 800  }
  0x11   :  { %1701 = vsyncadd [#allocation3], 4294966496 }
  0x12   :  { %1702 = dma.done.wait [#allocation7], 1536  }
  0x13   :  { %1703 = vsyncadd [#allocation7], 4294965760 }
  0x14   :  { %79 = sfence }
  0x15   :  { %v1757_v0 = vld [vmem:[#allocation6 + $0x18] sm:$0xff]  ;;  %v1759_v1 = vld [vmem:[#allocation6 + $0x10] sm:$0xff]  ;;  %s93_s1 = sld [smem:[#allocation2]]  ;;  %v1763_v2 = vld [vmem:[#allocation6 + $0x8] sm:$0xff]  ;;  %vm114_vm0 = vcmask 1040384   ;;  %v1712_v5 = vmov 0.0  }
  0x16   :  { %313 = vmatpush.msra.mxu0 %v1757_v0  ;;  %s1387_s3 = sld [smem:[#allocation2 + $0x1]]  ;;  %442 = vmatpush.msra.mxu2 %v1757_v0  ;;  %v1767_v3 = vld [vmem:[#allocation6] sm:$0xff]  ;;  %vm116_vm1 = vcmask 1041408   ;;  %vm118_vm2 = vcmask 1042432   ;;  %vm120_vm3 = vcmask 1043456   ;;  %s1713_s20 = smov 64  }
  0x17   :  { %s1388_s14 = sld [smem:[#allocation2 + $0x2]]  ;;  %s1714_s21 = smov 32   ;;  %v1791_v35 = vld [vmem:[#allocation8 + $0x38] sm:$0xff]  ;;  %v1793_v36 = vld [vmem:[#allocation8 + $0x30] sm:$0xff]  ;;  %v1797_v37 = vld [vmem:[#allocation8 + $0x28] sm:$0xff]  ;;  %vm297_vm8 = vcmask 261120  }
  0x18   :  { %314 = vmatpush.msra.mxu0 %v1759_v1  ;;  %s1389_s15 = sld [smem:[#allocation2 + $0x3]]  ;;  %443 = vmatpush.msra.mxu2 %v1759_v1  ;;  %v1802_v38 = vld [vmem:[#allocation8 + $0x20] sm:$0xff]  ;;  %v1807_v39 = vld [vmem:[#allocation8 + $0x18] sm:$0xff]  ;;  %v1812_v40 = vld [vmem:[#allocation8 + $0x10] sm:$0xff]  ;;  %vm367_vm9 = vcmask 523264  }
  0x19   :  { %379 = vmatpush.msra.mxu1 %v1791_v35  ;;  %508 = vmatpush.msra.mxu3 %v1791_v35  ;;  %v1817_v41 = vld [vmem:[#allocation8 + $0x8] sm:$0xff]  ;;  %v1827_v44 = vld [vmem:[#allocation8] sm:$0xff]  ;;  %s1391_s22 = sld [smem:[#allocation2 + $0x81]] }
  0x1a   :  { %315 = vmatpush.msra.mxu0 %v1763_v2  ;;  %444 = vmatpush.msra.mxu2 %v1763_v2  ;;  %s1392_s23 = sld [smem:[#allocation2 + $0x82]]  ;;  %v1866_v51 = vld [vmem:[%s2098_s4] ss:$0 sm:$0xff] }
  0x1b   :  { %s94_s16 = scalar_lea.vmem [#allocation5], %s93_s1  ;;  %380 = vmatpush.msra.mxu1 %v1793_v36  ;;  %509 = vmatpush.msra.mxu3 %v1793_v36  ;;  %s1844_s24 = sld [smem:[#allocation2 + $0x83]] }
  0x1c   :  { %316 = vmatpush.msra.mxu0 %v1767_v3  ;;  %v95_v4 = vld [vmem:[%s94_s16] sm:$0x1]  ;;  %445 = vmatpush.msra.mxu2 %v1767_v3  ;;  %s97_s17 = scalar_lea.vmem [#allocation5], %s1387_s3  ;;  %s1390_s28 = sld [smem:[#allocation2 + $0x80]] }
  0x1d   :  { %317 = vmatmul.f32.vlgmr.msra.gmra.mxu0 %v1712_v5  ;;  %v1460_v6 = vld [vmem:[%s97_s17] ss:$0 sm:$0xff]  ;;  %s100_s18 = scalar_lea.vmem [#allocation5], %s1388_s14  ;;  %381 = vmatpush.msra.mxu1 %v1797_v37  ;;  %s1886_s2 = sld [smem:[#allocation2 + $0x101]] }
  0x1e   :  { %v1461_v7 = vld [vmem:[%s100_s18] ss:$0 sm:$0xff]  ;;  %571 = vmatpush.msrb.mxu0 %v1757_v0  ;;  %s103_s19 = scalar_lea.vmem [#allocation5], %s1389_s15  ;;  %v115_v9 = vsel %vm114_vm0, %v95_v4, %v1460_v6  ;;  %637 = vmatpush.msrb.mxu2 %v1791_v35  ;;  %s1888_s7 = sld [smem:[#allocation2 + $0x102]] }
  0x1f   :  { %v1462_v8 = vld [vmem:[%s103_s19] ss:$0 sm:$0xff]  ;;  %v117_v10 = vsel %vm116_vm1, %v115_v9, %v1461_v7  ;;  %510 = vmatpush.msra.mxu3 %v1797_v37  ;;  %382 = vmatpush.msra.mxu1 %v1802_v38  ;;  %s126_s25 = scalar_lea.vmem [#allocation5], %s1391_s22  ;;  %s1890_s8 = sld [smem:[#allocation2 + $0x103]] }
  0x20   :  { %572 = vmatpush.msrb.mxu0 %v1759_v1  ;;  %v119_v11 = vsel %vm118_vm2, %v117_v10, %v1462_v8  ;;  %638 = vmatpush.msrb.mxu2 %v1793_v36  ;;  %s129_s26 = scalar_lea.vmem [#allocation5], %s1392_s23  ;;  %v1464_v47 = vld [vmem:[%s126_s25] ss:$0 sm:$0xff]  ;;  %s1394_s0 = sld [smem:[#allocation2 + $0x100]] }
  0x21   :  { %v121_v12 = vsel %vm120_vm3, %v119_v11, 0.0  ;;  %511 = vmatpush.msra.mxu3 %v1802_v38  ;;  %383 = vmatpush.msra.mxu1 %v1807_v39  ;;  %s132_s27 = scalar_lea.vmem [#allocation5], %s1844_s24  ;;  %v1465_v49 = vld [vmem:[%s129_s26] ss:$0 sm:$0xff]  ;;  %s1934_s13 = sld [smem:[#allocation2 + $0x181]] }
  0x22   :  { %573 = vmatpush.msrb.mxu0 %v1763_v2  ;;  %639 = vmatpush.msrb.mxu2 %v1797_v37  ;;  %s123_s29 = scalar_lea.vmem [#allocation5], %s1390_s28  ;;  %v1466_v52 = vld [vmem:[%s132_s27] ss:$0 sm:$0xff]  ;;  %s1936_s1 = sld [smem:[#allocation2 + $0x182]] }
  0x23   :  { %512 = vmatpush.msra.mxu3 %v1807_v39  ;;  %384 = vmatpush.msra.mxu1 %v1812_v40  ;;  %v124_v48 = vld [vmem:[%s123_s29] sm:$0x1]  ;;  %s151_s9 = scalar_lea.vmem [#allocation5], %s1886_s2  ;;  %s1938_s3 = sld [smem:[#allocation2 + $0x183]] }
  0x24   :  { %574 = vmatpush.msrb.mxu0 %v1767_v3  ;;  %640 = vmatpush.msrb.mxu2 %v1802_v38  ;;  %v143_v50 = vsel %vm114_vm0, %v124_v48, %v1464_v47  ;;  %s154_s10 = scalar_lea.vmem [#allocation5], %s1888_s7  ;;  %s1398_s17 = sld [smem:[#allocation2 + $0x180]] }
  0x25   :  { %513 = vmatpush.msra.mxu3 %v1812_v40  ;;  %385 = vmatpush.msra.mxu1 %v1817_v41  ;;  %v144_v53 = vsel %vm116_vm1, %v143_v50, %v1465_v49  ;;  %s157_s11 = scalar_lea.vmem [#allocation5], %s1890_s8  ;;  %s1403_s19 = sld [smem:[#allocation2 + $0x201]] }
  0x26   :  { %700 = vmatpush.msra.mxu0 %v1757_v0  ;;  %641 = vmatpush.msrb.mxu2 %v1807_v39  ;;  %v145_v56 = vsel %vm118_vm2, %v144_v53, %v1466_v52  ;;  %s148_s12 = scalar_lea.vmem [#allocation5], %s1394_s0  ;;  %s1404_s22 = sld [smem:[#allocation2 + $0x202]] }
  0x27   :  { %514 = vmatpush.msra.mxu3 %v1817_v41  ;;  %386 = vmatpush.msra.mxu1 %v1827_v44  ;;  %v146_v57 = vsel %vm120_vm3, %v145_v56, 0.0  ;;  %v1467_v56 = vld [vmem:[%s151_s9] ss:$0 sm:$0xff]  ;;  %s176_s14 = scalar_lea.vmem [#allocation5], %s1934_s13  ;;  %s1405_s23 = sld [smem:[#allocation2 + $0x203]] }
  0x28   :  { %701 = vmatpush.msra.mxu0 %v1759_v1  ;;  %642 = vmatpush.msrb.mxu2 %v1812_v40  ;;  %s179_s15 = scalar_lea.vmem [#allocation5], %s1936_s1  ;;  %s1402_s27 = sld [smem:[#allocation2 + $0x200]] }
  0x29   :  { %515 = vmatpush.msra.mxu3 %v1827_v44  ;;  %766 = vmatpush.msrb.mxu1 %v1791_v35  ;;  %s182_s16 = scalar_lea.vmem [#allocation5], %s1938_s3  ;;  %s1407_s29 = sld [smem:[#allocation2 + $0x281]] }
  0x2a   :  { %702 = vmatpush.msra.mxu0 %v1763_v2  ;;  %643 = vmatpush.msrb.mxu2 %v1817_v41  ;;  %s173_s18 = scalar_lea.vmem [#allocation5], %s1398_s17  ;;  %s1408_s30 = sld [smem:[#allocation2 + $0x282]] }
  0x2b   :  { %829 = vmatpush.msrb.mxu3 %v1757_v0  ;;  %767 = vmatpush.msrb.mxu1 %v1793_v36  ;;  %s201_s24 = scalar_lea.vmem [#allocation5], %s1403_s19  ;;  %s1409_s6 = sld [smem:[#allocation2 + $0x283]] }
  0x2c   :  { %703 = vmatpush.msra.mxu0 %v1767_v3  ;;  %644 = vmatpush.msrb.mxu2 %v1827_v44  ;;  %s204_s25 = scalar_lea.vmem [#allocation5], %s1404_s22  ;;  %s1406_s9 = sld [smem:[#allocation2 + $0x280]] }
  0x2d   :  { %830 = vmatpush.msrb.mxu3 %v1759_v1  ;;  %768 = vmatpush.msrb.mxu1 %v1797_v37  ;;  %s207_s26 = scalar_lea.vmem [#allocation5], %s1405_s23  ;;  %s1412_s0 = sld [smem:[#allocation2 + $0x302]] }
  0x2e   :  { %s198_s28 = scalar_lea.vmem [#allocation5], %s1402_s27  ;;  %s1417_s19 = sld [smem:[#allocation2 + $0x383]] }
  0x2f   :  { %831 = vmatpush.msrb.mxu3 %v1763_v2  ;;  %769 = vmatpush.msrb.mxu1 %v1802_v38  ;;  %s226_s2 = scalar_lea.vmem [#allocation5], %s1407_s29 }
  0x30   :  { %s229_s7 = scalar_lea.vmem [#allocation5], %s1408_s30 }
  0x31   :  { %832 = vmatpush.msrb.mxu3 %v1767_v3  ;;  %770 = vmatpush.msrb.mxu1 %v1807_v39  ;;  %s232_s8 = scalar_lea.vmem [#allocation5], %s1409_s6 }
  0x33   :  { %771 = vmatpush.msrb.mxu1 %v1812_v40  ;;  %s254_s1 = scalar_lea.vmem [#allocation5], %s1412_s0 }
  0x35   :  { %772 = vmatpush.msrb.mxu1 %v1817_v41 }
  0x37   :  { %773 = vmatpush.msrb.mxu1 %v1827_v44 }
  0x9a   :  { %v318_v13 = vpop.f32.mrf.mxu0 }
  0x9b   :  { %v321_v14 = vadd.f32 %v318_v13, %v121_v12 }
  0x9d   :  { %1485 = vtanh.f32 %v321_v14  ;;  %v1418_v16 = vmul.f32 -1.442695, %v321_v14 }
  0x9f   :  { %1487 = vpow2.f32 %v1418_v16 }
  0xa3   :  { %v1486_v15 = vpop.eup %1485 }
  0xa4   :  { %344 = vrot.lane.b32.xlu0 %v1486_v15, %s1713_s20 }
  0xa5   :  { %v1488_v17 = vpop.eup %1487 }
  0xa6   :  { %v325_v18 = vadd.f32 1.0, %v1488_v17 }
  0xa8   :  { %1489 = vrcp.f32 %v325_v18  ;;  %v337_v24 = vand.u32 2147483648, %v325_v18  ;;  %vm331_vm5 = vweird.f32 %v325_v18  ;;  %v335_v25 = vand.u32 2147483647, %v325_v18 }
  0xaa   :  { %v338_v27 = vor.u32 1.1754944e-38, %v337_v24  ;;  %vm336_vm7 = vcmp.eq.f32.partialorder %v335_v25, 8.507059e+37 }
  0xae   :  { %v1490_v19 = vpop.eup %1489 }
  0xaf   :  { %v327_v20 = vmul.f32 %v1490_v19, %v325_v18  ;;  %vm332_vm4 = vweird.f32 %v1490_v19 }
  0xb0   :  { %vm333_vm6 = vmor %vm331_vm5, %vm332_vm4 }
  0xb1   :  { %v328_v21 = vsub.f32 1.0, %v327_v20 }
  0xb3   :  { %v329_v22 = vmul.f32 %v1490_v19, %v328_v21 }
  0xb5   :  { %v330_v23 = vadd.f32 %v1490_v19, %v329_v22 }
  0xb7   :  { %v334_v26 = vsel %vm333_vm6, %v1490_v19, %v330_v23 }
  0xb8   :  { %v339_v29 = vsel %vm336_vm7, %v338_v27, %v334_v26 }
  0xb9   :  { %v342_v31 = vmul.f32 0.0, %v339_v29 }
 0x116   :  { %v345_v28 = vpop.permute.xlu0 %344 }
 0x117   :  { %v347_v30 = vmul.f32 %v345_v28, %v339_v29 }
 0x119   :  { %349 = vrot.lane.b32.xlu0 %v347_v30, %s1714_s21 }
 0x18b   :  { %v350_v32 = vpop.permute.xlu0 %349 }
 0x18c   :  { %v1787_v33 = vadd.f32 %v350_v32, %v342_v31 }
 0x18e   :  { %1491 = vtanh.f32 %v1787_v33 }
 0x194   :  { %v1492_v34 = vpop.eup %1491 }
 0x195   :  { %355 = vrot.lane.b32.xlu1 %v1492_v34, %s1713_s20 }
 0x207   :  { %v356_v42 = vpop.permute.xlu1 %355 }
 0x208   :  { %v358_v43 = vmul.f32 %v356_v42, %v339_v29 }
 0x20a   :  { %360 = vrot.lane.b32.xlu1 %v358_v43, %s1714_s21 }
 0x27c   :  { %v361_v45 = vpop.permute.xlu1 %360 }
 0x27d   :  { %1421 = vmatmul.msk.f32.vlgmr.msra.gmra.mxu2 %vm297_vm8, %v361_v45  ;;  %v363_v46 = vsel %vm297_vm8, %v361_v45, 0.0 }
 0x27e   :  { %1419 = vmatmul.msk.f32.vlgmr.msra.gmra.mxu1 %vm367_vm9, %v363_v46  ;;  %958 = vmatpush.msra.mxu2 %v1757_v0 }
 0x27f   :  { %1282 = vmatpush.msra.mxu1 %v1791_v35 }
 0x280   :  { %959 = vmatpush.msra.mxu2 %v1759_v1 }
 0x281   :  { %1283 = vmatpush.msra.mxu1 %v1793_v36 }
 0x282   :  { %960 = vmatpush.msra.mxu2 %v1763_v2 }
 0x283   :  { %1284 = vmatpush.msra.mxu1 %v1797_v37 }
 0x284   :  { %961 = vmatpush.msra.mxu2 %v1767_v3 }
 0x285   :  { %1285 = vmatpush.msra.mxu1 %v1802_v38 }
 0x287   :  { %1286 = vmatpush.msra.mxu1 %v1807_v39 }
 0x289   :  { %1287 = vmatpush.msra.mxu1 %v1812_v40 }
 0x28b   :  { %1288 = vmatpush.msra.mxu1 %v1817_v41 }
 0x28d   :  { %1289 = vmatpush.msra.mxu1 %v1827_v44 }
 0x2fb   :  { %v388_v54 = vpop.f32.mrf.mxu1 }
 0x2fc   :  { %v389_v55 = vadd.f32 %v1866_v51, %v388_v54 }
 0x2fe   :  { %1493 = vtanh.f32 %v389_v55  ;;  %v1420_v62 = vmul.f32 -1.442695, %v389_v55 }
 0x300   :  { %v447_v58 = vpop.f32.mrf.mxu2 }
 0x301   :  { %v450_v59 = vadd.f32 %v447_v58, %v146_v57  ;;  %v149_v57 = vld [vmem:[%s148_s12] sm:$0x1]  ;;  %s1413_s12 = sld [smem:[#allocation2 + $0x303]] }
 0x302   :  { %v1468_v58 = vld [vmem:[%s154_s10] ss:$0 sm:$0xff]  ;;  %s223_s10 = scalar_lea.vmem [#allocation5], %s1406_s9 }
 0x303   :  { %1495 = vtanh.f32 %v450_v59  ;;  %v1422_v63 = vmul.f32 -1.442695, %v450_v59  ;;  %v168_v59 = vsel %vm114_vm0, %v149_v57, %v1467_v56 }
 0x304   :  { %v1494_v60 = vpop.eup %1493  ;;  %1497 = vpow2.f32 %v1420_v62 }
 0x305   :  { %413 = vrot.lane.b32.xlu2 %v1494_v60, %s1713_s20  ;;  %1499 = vpow2.f32 %v1422_v63  ;;  %v1469_v60 = vld [vmem:[%s157_s11] ss:$0 sm:$0xff]  ;;  %s1411_s11 = sld [smem:[#allocation2 + $0x301]] }
 0x307   :  { %s257_s3 = scalar_lea.vmem [#allocation5], %s1413_s12 }
 0x309   :  { %v1496_v61 = vpop.eup %1495 }
 0x30a   :  { %v1498_v4 = vpop.eup %1497 }
 0x30b   :  { %v394_v5 = vadd.f32 1.0, %v1498_v4  ;;  %v1500_v6 = vpop.eup %1499  ;;  %s251_s13 = scalar_lea.vmem [#allocation5], %s1411_s11 }
 0x30c   :  { %v454_v7 = vadd.f32 1.0, %v1500_v6 }
 0x30d   :  { %473 = vrot.lane.b32.xlu2 %v1496_v61, %s1713_s20  ;;  %1501 = vrcp.f32 %v394_v5  ;;  %v406_v16 = vand.u32 2147483648, %v394_v5  ;;  %vm400_vm11 = vweird.f32 %v394_v5  ;;  %v404_v17 = vand.u32 2147483647, %v394_v5 }
 0x30e   :  { %1503 = vrcp.f32 %v454_v7  ;;  %v466_v25 = vand.u32 2147483648, %v454_v7  ;;  %vm460_vm15 = vweird.f32 %v454_v7  ;;  %v464_v26 = vand.u32 2147483647, %v454_v7 }
 0x30f   :  { %v407_v20 = vor.u32 1.1754944e-38, %v406_v16  ;;  %vm405_vm13 = vcmp.eq.f32.partialorder %v404_v17, 8.507059e+37  ;;  %v169_v61 = vsel %vm116_vm1, %v168_v59, %v1468_v58 }
 0x310   :  { %v467_v28 = vor.u32 1.1754944e-38, %v466_v25  ;;  %vm465_vm5 = vcmp.eq.f32.partialorder %v464_v26, 8.507059e+37  ;;  %v170_v62 = vsel %vm118_vm2, %v169_v61, %v1469_v60 }
 0x311   :  { %v171_v63 = vsel %vm120_vm3, %v170_v62, 0.0 }
 0x313   :  { %v1502_v8 = vpop.eup %1501 }
 0x314   :  { %v396_v9 = vmul.f32 %v1502_v8, %v394_v5  ;;  %v1504_v11 = vpop.eup %1503  ;;  %vm401_vm10 = vweird.f32 %v1502_v8 }
 0x315   :  { %v456_v13 = vmul.f32 %v1504_v11, %v454_v7  ;;  %vm402_vm12 = vmor %vm400_vm11, %vm401_vm10  ;;  %vm461_vm14 = vweird.f32 %v1504_v11 }
 0x316   :  { %v397_v10 = vsub.f32 1.0, %v396_v9  ;;  %vm462_vm4 = vmor %vm460_vm15, %vm461_vm14 }
 0x317   :  { %v457_v15 = vsub.f32 1.0, %v456_v13 }
 0x318   :  { %v398_v12 = vmul.f32 %v1502_v8, %v397_v10 }
 0x319   :  { %v458_v19 = vmul.f32 %v1504_v11, %v457_v15 }
 0x31a   :  { %v399_v14 = vadd.f32 %v1502_v8, %v398_v12 }
 0x31b   :  { %v459_v24 = vadd.f32 %v1504_v11, %v458_v19 }
 0x31c   :  { %v403_v18 = vsel %vm402_vm12, %v1502_v8, %v399_v14 }
 0x31d   :  { %v408_v22 = vsel %vm405_vm13, %v407_v20, %v403_v18  ;;  %v463_v27 = vsel %vm462_vm4, %v1504_v11, %v459_v24 }
 0x31e   :  { %v468_v29 = vsel %vm465_vm5, %v467_v28, %v463_v27  ;;  %v411_v32 = vmul.f32 0.0, %v408_v22 }
 0x31f   :  { %v471_v43 = vmul.f32 %v468_v29, %v1787_v33 }
 0x35f   :  { %v414_v21 = vpop.permute.xlu2 %413 }
 0x360   :  { %v416_v23 = vmul.f32 %v414_v21, %v408_v22 }
 0x362   :  { %418 = vrot.lane.b32.xlu0 %v416_v23, %s1714_s21 }
 0x367   :  { %v474_v30 = vpop.permute.xlu2 %473 }
 0x368   :  { %v476_v31 = vmul.f32 %v474_v30, %v468_v29 }
 0x36a   :  { %478 = vrot.lane.b32.xlu1 %v476_v31, %s1714_s21 }
 0x3d4   :  { %v419_v34 = vpop.permute.xlu0 %418 }
 0x3d5   :  { %v1876_v42 = vadd.f32 %v419_v34, %v411_v32 }
 0x3d7   :  { %1505 = vtanh.f32 %v1876_v42 }
 0x3dc   :  { %v479_v45 = vpop.permute.xlu1 %478 }
 0x3dd   :  { %v1506_v46 = vpop.eup %1505  ;;  %v1880_v47 = vadd.f32 %v479_v45, %v471_v43 }
 0x3de   :  { %424 = vrot.lane.b32.xlu2 %v1506_v46, %s1713_s20 }
 0x3df   :  { %1507 = vtanh.f32 %v1880_v47 }
 0x3e5   :  { %v1508_v48 = vpop.eup %1507 }
 0x3e6   :  { %484 = vrot.lane.b32.xlu0 %v1508_v48, %s1713_s20 }
 0x438   :  { %v425_v49 = vpop.permute.xlu2 %424 }
 0x439   :  { %v427_v50 = vmul.f32 %v425_v49, %v408_v22 }
 0x43b   :  { %493 = vrot.lane.b32.xlu2 %v427_v50, %s1713_s20 }
 0x458   :  { %v485_v33 = vpop.permute.xlu0 %484 }
 0x459   :  { %v487_v52 = vmul.f32 %v485_v33, %v468_v29 }
 0x45b   :  { %489 = vrot.lane.b32.xlu1 %v487_v52, %s1714_s21 }
 0x495   :  { %v494_v53 = vpop.permute.xlu2 %493 }
 0x4cd   :  { %v490_v54 = vpop.permute.xlu1 %489 }
 0x4ce   :  { %1425 = vmatmul.msk.f32.vlgmr.msrb.gmra.mxu0 %vm297_vm8, %v490_v54  ;;  %v496_v55 = vsel %vm297_vm8, %v490_v54, %v494_v53 }
 0x4cf   :  { %1423 = vmatmul.msk.f32.vlgmr.msra.gmra.mxu3 %vm367_vm9, %v496_v55  ;;  %895 = vmatpush.msrb.mxu0 %v1791_v35 }
 0x4d0   :  { %1024 = vmatpush.msra.mxu3 %v1791_v35 }
 0x4d1   :  { %896 = vmatpush.msrb.mxu0 %v1793_v36 }
 0x4d2   :  { %1025 = vmatpush.msra.mxu3 %v1793_v36 }
 0x4d3   :  { %897 = vmatpush.msrb.mxu0 %v1797_v37 }
 0x4d4   :  { %1026 = vmatpush.msra.mxu3 %v1797_v37 }
 0x4d5   :  { %898 = vmatpush.msrb.mxu0 %v1802_v38 }
 0x4d6   :  { %1027 = vmatpush.msra.mxu3 %v1802_v38 }
 0x4d7   :  { %899 = vmatpush.msrb.mxu0 %v1807_v39 }
 0x4d8   :  { %1028 = vmatpush.msra.mxu3 %v1807_v39 }
 0x4d9   :  { %900 = vmatpush.msrb.mxu0 %v1812_v40 }
 0x4da   :  { %1029 = vmatpush.msra.mxu3 %v1812_v40 }
 0x4db   :  { %901 = vmatpush.msrb.mxu0 %v1817_v41 }
 0x4dc   :  { %1030 = vmatpush.msra.mxu3 %v1817_v41 }
 0x4dd   :  { %902 = vmatpush.msrb.mxu0 %v1827_v44 }
 0x4de   :  { %1031 = vmatpush.msra.mxu3 %v1827_v44 }
 0x54b   :  { %v576_v4 = vpop.f32.mrf.mxu0 }
 0x54c   :  { %v579_v5 = vadd.f32 %v576_v4, %v171_v63  ;;  %v1470_v4 = vld [vmem:[%s176_s14] ss:$0 sm:$0xff]  ;;  %s1410_s14 = sld [smem:[#allocation2 + $0x300]] }
 0x54e   :  { %1509 = vtanh.f32 %v579_v5  ;;  %v1426_v10 = vmul.f32 -1.442695, %v579_v5  ;;  %v174_v5 = vld [vmem:[%s173_s18] sm:$0x1]  ;;  %s1416_s18 = sld [smem:[#allocation2 + $0x382]] }
 0x552   :  { %v517_v6 = vpop.f32.mrf.mxu3 }
 0x553   :  { %v518_v7 = vadd.f32 %v1866_v51, %v517_v6  ;;  %v1471_v6 = vld [vmem:[%s179_s15] ss:$0 sm:$0xff]  ;;  %s248_s15 = scalar_lea.vmem [#allocation5], %s1410_s14 }
 0x554   :  { %v1510_v8 = vpop.eup %1509  ;;  %s279_s23 = scalar_lea.vmem [#allocation5], %s1416_s18 }
 0x555   :  { %1511 = vtanh.f32 %v518_v7  ;;  %602 = vrot.lane.b32.xlu0 %v1510_v8, %s1713_s20  ;;  %v1424_v11 = vmul.f32 -1.442695, %v518_v7 }
 0x556   :  { %1513 = vpow2.f32 %v1426_v10 }
 0x557   :  { %1515 = vpow2.f32 %v1424_v11 }
 0x55b   :  { %v1512_v9 = vpop.eup %1511 }
 0x55c   :  { %542 = vrot.lane.b32.xlu1 %v1512_v9, %s1713_s20  ;;  %v1514_v12 = vpop.eup %1513 }
 0x55d   :  { %v583_v13 = vadd.f32 1.0, %v1514_v12  ;;  %v1516_v14 = vpop.eup %1515 }
 0x55e   :  { %v523_v15 = vadd.f32 1.0, %v1516_v14 }
 0x55f   :  { %1517 = vrcp.f32 %v583_v13  ;;  %v595_v24 = vand.u32 2147483648, %v583_v13  ;;  %vm589_vm7 = vweird.f32 %v583_v13  ;;  %v593_v25 = vand.u32 2147483647, %v583_v13 }
 0x560   :  { %1519 = vrcp.f32 %v523_v15  ;;  %v535_v34 = vand.u32 2147483648, %v523_v15  ;;  %vm529_vm13 = vweird.f32 %v523_v15  ;;  %v533_v43 = vand.u32 2147483647, %v523_v15 }
 0x561   :  { %v596_v28 = vor.u32 1.1754944e-38, %v595_v24  ;;  %vm594_vm11 = vcmp.eq.f32.partialorder %v593_v25, 8.507059e+37 }
 0x562   :  { %v536_v46 = vor.u32 1.1754944e-38, %v535_v34  ;;  %vm534_vm15 = vcmp.eq.f32.partialorder %v533_v43, 8.507059e+37 }
 0x565   :  { %v1518_v16 = vpop.eup %1517 }
 0x566   :  { %v585_v17 = vmul.f32 %v1518_v16, %v583_v13  ;;  %v1520_v18 = vpop.eup %1519  ;;  %vm590_vm6 = vweird.f32 %v1518_v16 }
 0x567   :  { %v525_v20 = vmul.f32 %v1520_v18, %v523_v15  ;;  %vm591_vm10 = vmor %vm589_vm7, %vm590_vm6  ;;  %vm530_vm12 = vweird.f32 %v1520_v18 }
 0x568   :  { %v586_v19 = vsub.f32 1.0, %v585_v17  ;;  %vm531_vm14 = vmor %vm529_vm13, %vm530_vm12 }
 0x569   :  { %v526_v22 = vsub.f32 1.0, %v525_v20 }
 0x56a   :  { %v587_v21 = vmul.f32 %v1518_v16, %v586_v19 }
 0x56b   :  { %v527_v26 = vmul.f32 %v1520_v18, %v526_v22 }
 0x56c   :  { %v588_v23 = vadd.f32 %v1518_v16, %v587_v21 }
 0x56d   :  { %v528_v31 = vadd.f32 %v1520_v18, %v527_v26 }
 0x56e   :  { %v592_v27 = vsel %vm591_vm10, %v1518_v16, %v588_v23 }
 0x56f   :  { %v597_v30 = vsel %vm594_vm11, %v596_v28, %v592_v27  ;;  %v532_v45 = vsel %vm531_vm14, %v1520_v18, %v528_v31 }
 0x570   :  { %v537_v49 = vsel %vm534_vm15, %v536_v46, %v532_v45  ;;  %v600_v33 = vmul.f32 %v597_v30, %v1880_v47 }
 0x571   :  { %v540_v55 = vmul.f32 %v537_v49, %v1876_v42 }
 0x5c7   :  { %v603_v29 = vpop.permute.xlu0 %602 }
 0x5c8   :  { %v605_v32 = vmul.f32 %v603_v29, %v597_v30 }
 0x5ca   :  { %607 = vrot.lane.b32.xlu2 %v605_v32, %s1714_s21 }
 0x5ce   :  { %v543_v48 = vpop.permute.xlu1 %542 }
 0x5cf   :  { %v545_v50 = vmul.f32 %v543_v48, %v537_v49 }
 0x5d1   :  { %547 = vrot.lane.b32.xlu0 %v545_v50, %s1714_s21 }
 0x624   :  { %v608_v52 = vpop.permute.xlu2 %607 }
 0x625   :  { %v1925_v53 = vadd.f32 %v608_v52, %v600_v33 }
 0x627   :  { %1521 = vtanh.f32 %v1925_v53 }
 0x62d   :  { %v1522_v54 = vpop.eup %1521 }
 0x62e   :  { %613 = vrot.lane.b32.xlu1 %v1522_v54, %s1713_s20 }
 0x643   :  { %v548_v56 = vpop.permute.xlu0 %547 }
 0x644   :  { %v1930_v57 = vadd.f32 %v548_v56, %v540_v55 }
 0x646   :  { %1523 = vtanh.f32 %v1930_v57 }
 0x64c   :  { %v1524_v58 = vpop.eup %1523 }
 0x64d   :  { %553 = vrot.lane.b32.xlu2 %v1524_v58, %s1713_s20 }
 0x6a0   :  { %v614_v47 = vpop.permute.xlu1 %613 }
 0x6a1   :  { %v616_v59 = vmul.f32 %v614_v47, %v597_v30 }
 0x6a3   :  { %618 = vrot.lane.b32.xlu0 %v616_v59, %s1714_s21 }
 0x6a7   :  { %v554_v42 = vpop.permute.xlu2 %553 }
 0x6a8   :  { %v556_v60 = vmul.f32 %v554_v42, %v537_v49 }
 0x6aa   :  { %622 = vrot.lane.b32.xlu1 %v556_v60, %s1713_s20 }
 0x715   :  { %v619_v61 = vpop.permute.xlu0 %618 }
 0x716   :  { %1429 = vmatmul.msk.f32.vlgmr.msra.gmra.mxu0 %vm297_vm8, %v619_v61 }
 0x717   :  { %1216 = vmatpush.msra.mxu0 %v1757_v0 }
 0x719   :  { %1217 = vmatpush.msra.mxu0 %v1759_v1 }
 0x71b   :  { %1218 = vmatpush.msra.mxu0 %v1763_v2 }
 0x71c   :  { %v623_v62 = vpop.permute.xlu1 %622 }
 0x71d   :  { %v625_v63 = vsel %vm297_vm8, %v619_v61, %v623_v62  ;;  %1219 = vmatpush.msra.mxu0 %v1767_v3 }
 0x71e   :  { %1427 = vmatmul.msk.f32.vlgmr.msrb.gmra.mxu2 %vm367_vm9, %v625_v63 }
 0x71f   :  { %1153 = vmatpush.msrb.mxu2 %v1791_v35  ;;  %v193_v35 = vsel %vm114_vm0, %v174_v5, %v1470_v4  ;;  %v1473_v4 = vld [vmem:[%s201_s24] ss:$0 sm:$0xff]  ;;  %s282_s24 = scalar_lea.vmem [#allocation5], %s1417_s19 }
 0x720   :  { %v199_v5 = vld [vmem:[%s198_s28] sm:$0x1] }
 0x721   :  { %1154 = vmatpush.msrb.mxu2 %v1793_v36  ;;  %v1472_v36 = vld [vmem:[%s182_s16] ss:$0 sm:$0xff] }
 0x723   :  { %1155 = vmatpush.msrb.mxu2 %v1797_v37  ;;  %v194_v37 = vsel %vm116_vm1, %v193_v35, %v1471_v6  ;;  %v1474_v6 = vld [vmem:[%s204_s25] ss:$0 sm:$0xff]  ;;  %v218_v35 = vsel %vm114_vm0, %v199_v5, %v1473_v4  ;;  %s1414_s25 = sld [smem:[#allocation2 + $0x380]] }
 0x724   :  { %v1478_v4 = vld [vmem:[%s232_s8] ss:$0 sm:$0xff] }
 0x725   :  { %1156 = vmatpush.msrb.mxu2 %v1802_v38  ;;  %v195_v38 = vsel %vm118_vm2, %v194_v37, %v1472_v36  ;;  %v1475_v36 = vld [vmem:[%s207_s26] ss:$0 sm:$0xff] }
 0x727   :  { %1157 = vmatpush.msrb.mxu2 %v1807_v39  ;;  %v196_v39 = vsel %vm120_vm3, %v195_v38, 0.0 }
 0x729   :  { %1158 = vmatpush.msrb.mxu2 %v1812_v40  ;;  %s273_s26 = scalar_lea.vmem [#allocation5], %s1414_s25 }
 0x72b   :  { %1159 = vmatpush.msrb.mxu2 %v1817_v41 }
 0x72d   :  { %1160 = vmatpush.msrb.mxu2 %v1827_v44 }
 0x793   :  { %v705_v7 = vpop.f32.mrf.mxu0 }
 0x794   :  { %v708_v40 = vadd.f32 %v705_v7, %v196_v39 }
 0x796   :  { %1525 = vtanh.f32 %v708_v40  ;;  %v1430_v10 = vmul.f32 -1.442695, %v708_v40 }
 0x79c   :  { %v1526_v41 = vpop.eup %1525 }
 0x79d   :  { %731 = vrot.lane.b32.xlu2 %v1526_v41, %s1713_s20 }
 0x7a1   :  { %v646_v44 = vpop.f32.mrf.mxu2 }
 0x7a2   :  { %v647_v8 = vadd.f32 %v1866_v51, %v646_v44 }
 0x7a4   :  { %1527 = vtanh.f32 %v647_v8  ;;  %v1428_v17 = vmul.f32 -1.442695, %v647_v8 }
 0x7a5   :  { %1529 = vpow2.f32 %v1430_v10 }
 0x7aa   :  { %v1528_v9 = vpop.eup %1527 }
 0x7ab   :  { %671 = vrot.lane.b32.xlu0 %v1528_v9, %s1713_s20  ;;  %v1530_v11 = vpop.eup %1529 }
 0x7ac   :  { %v712_v12 = vadd.f32 1.0, %v1530_v11 }
 0x7ae   :  { %1531 = vrcp.f32 %v712_v12  ;;  %v724_v19 = vand.u32 2147483648, %v712_v12  ;;  %vm718_vm5 = vweird.f32 %v712_v12  ;;  %v722_v20 = vand.u32 2147483647, %v712_v12 }
 0x7af   :  { %1533 = vpow2.f32 %v1428_v17 }
 0x7b0   :  { %v725_v22 = vor.u32 1.1754944e-38, %v724_v19  ;;  %vm723_vm7 = vcmp.eq.f32.partialorder %v722_v20, 8.507059e+37 }
 0x7b4   :  { %v1532_v13 = vpop.eup %1531 }
 0x7b5   :  { %v714_v14 = vmul.f32 %v1532_v13, %v712_v12  ;;  %vm719_vm4 = vweird.f32 %v1532_v13  ;;  %v1534_v26 = vpop.eup %1533 }
 0x7b6   :  { %vm720_vm6 = vmor %vm718_vm5, %vm719_vm4  ;;  %v652_v27 = vadd.f32 1.0, %v1534_v26 }
 0x7b7   :  { %v715_v15 = vsub.f32 1.0, %v714_v14 }
 0x7b8   :  { %1535 = vrcp.f32 %v652_v27  ;;  %v664_v34 = vand.u32 2147483648, %v652_v27  ;;  %vm658_vm11 = vweird.f32 %v652_v27  ;;  %v662_v43 = vand.u32 2147483647, %v652_v27 }
 0x7b9   :  { %v716_v16 = vmul.f32 %v1532_v13, %v715_v15 }
 0x7ba   :  { %v665_v46 = vor.u32 1.1754944e-38, %v664_v34  ;;  %vm663_vm13 = vcmp.eq.f32.partialorder %v662_v43, 8.507059e+37 }
 0x7bb   :  { %v717_v18 = vadd.f32 %v1532_v13, %v716_v16 }
 0x7bd   :  { %v721_v21 = vsel %vm720_vm6, %v1532_v13, %v717_v18 }
 0x7be   :  { %v726_v23 = vsel %vm723_vm7, %v725_v22, %v721_v21  ;;  %v1536_v28 = vpop.eup %1535 }
 0x7bf   :  { %v654_v29 = vmul.f32 %v1536_v28, %v652_v27  ;;  %vm659_vm10 = vweird.f32 %v1536_v28  ;;  %v729_v33 = vmul.f32 %v726_v23, %v1925_v53 }
 0x7c0   :  { %vm660_vm12 = vmor %vm658_vm11, %vm659_vm10 }
 0x7c1   :  { %v655_v30 = vsub.f32 1.0, %v654_v29 }
 0x7c3   :  { %v656_v31 = vmul.f32 %v1536_v28, %v655_v30 }
 0x7c5   :  { %v657_v32 = vadd.f32 %v1536_v28, %v656_v31 }
 0x7c7   :  { %v661_v45 = vsel %vm660_vm12, %v1536_v28, %v657_v32 }
 0x7c8   :  { %v666_v49 = vsel %vm663_vm13, %v665_v46, %v661_v45 }
 0x7c9   :  { %v669_v56 = vmul.f32 %v666_v49, %v1930_v57 }
 0x7f7   :  { %v732_v24 = vpop.permute.xlu2 %731 }
 0x7f8   :  { %v734_v25 = vmul.f32 %v732_v24, %v726_v23 }
 0x7fa   :  { %736 = vrot.lane.b32.xlu1 %v734_v25, %s1714_s21 }
 0x81d   :  { %v672_v48 = vpop.permute.xlu0 %671 }
 0x81e   :  { %v674_v50 = vmul.f32 %v672_v48, %v666_v49 }
 0x820   :  { %676 = vrot.lane.b32.xlu2 %v674_v50, %s1714_s21 }
 0x86c   :  { %v737_v52 = vpop.permute.xlu1 %736 }
 0x86d   :  { %v1970_v54 = vadd.f32 %v737_v52, %v729_v33 }
 0x86f   :  { %1537 = vtanh.f32 %v1970_v54 }
 0x875   :  { %v1538_v55 = vpop.eup %1537 }
 0x876   :  { %742 = vrot.lane.b32.xlu0 %v1538_v55, %s1713_s20 }
 0x87a   :  { %v677_v58 = vpop.permute.xlu2 %676 }
 0x87b   :  { %v1975_v47 = vadd.f32 %v677_v58, %v669_v56 }
 0x87d   :  { %1539 = vtanh.f32 %v1975_v47 }
 0x883   :  { %v1540_v59 = vpop.eup %1539 }
 0x884   :  { %682 = vrot.lane.b32.xlu1 %v1540_v59, %s1713_s20 }
 0x8e8   :  { %v743_v42 = vpop.permute.xlu0 %742 }
 0x8e9   :  { %v745_v53 = vmul.f32 %v743_v42, %v726_v23 }
 0x8eb   :  { %747 = vrot.lane.b32.xlu2 %v745_v53, %s1714_s21 }
 0x8f6   :  { %v683_v60 = vpop.permute.xlu1 %682 }
 0x8f7   :  { %v685_v61 = vmul.f32 %v683_v60, %v666_v49 }
 0x8f9   :  { %751 = vrot.lane.b32.xlu0 %v685_v61, %s1713_s20  ;;  %v1476_v61 = vld [vmem:[%s226_s2] ss:$0 sm:$0xff] }
 0x945   :  { %v748_v57 = vpop.permute.xlu2 %747 }
 0x946   :  { %1433 = vmatmul.msk.f32.vlgmr.msrb.gmra.mxu3 %vm297_vm8, %v748_v57 }
 0x947   :  { %1087 = vmatpush.msrb.mxu3 %v1757_v0  ;;  %v219_v0 = vsel %vm116_vm1, %v218_v35, %v1474_v6 }
 0x949   :  { %1088 = vmatpush.msrb.mxu3 %v1759_v1  ;;  %v220_v1 = vsel %vm118_vm2, %v219_v0, %v1475_v36 }
 0x94b   :  { %1089 = vmatpush.msrb.mxu3 %v1763_v2  ;;  %v221_v2 = vsel %vm120_vm3, %v220_v1, 0.0 }
 0x94d   :  { %1090 = vmatpush.msrb.mxu3 %v1767_v3 }
 0x96b   :  { %v752_v62 = vpop.permute.xlu0 %751 }
 0x96c   :  { %v754_v63 = vsel %vm297_vm8, %v748_v57, %v752_v62  ;;  %v224_v57 = vld [vmem:[%s223_s10] sm:$0x1] }
 0x96d   :  { %1431 = vmatmul.msk.f32.vlgmr.msrb.gmra.mxu1 %vm367_vm9, %v754_v63  ;;  %v1477_v62 = vld [vmem:[%s229_s7] ss:$0 sm:$0xff]  ;;  %v243_v63 = vsel %vm114_vm0, %v224_v57, %v1476_v61 }
 0x96e   :  { %v244_v5 = vsel %vm116_vm1, %v243_v63, %v1477_v62  ;;  %v2041_v62 = vld [vmem:[%s2098_s4] ss:$0 sm:$0xff]  ;;  %s1415_s4 = sld [smem:[#allocation2 + $0x381]] }
 0x96f   :  { %v245_v6 = vsel %vm118_vm2, %v244_v5, %v1478_v4 }
 0x970   :  { %v246_v35 = vsel %vm120_vm3, %v245_v6, 0.0 }
 0x974   :  { %s276_s22 = scalar_lea.vmem [#allocation5], %s1415_s4 }
 0x9c9   :  { %v834_v3 = vpop.f32.mrf.mxu3 }
 0x9ca   :  { %v837_v37 = vadd.f32 %v834_v3, %v221_v2 }
 0x9cc   :  { %1541 = vtanh.f32 %v837_v37  ;;  %v1434_v41 = vmul.f32 -1.442695, %v837_v37 }
 0x9d2   :  { %v1542_v38 = vpop.eup %1541 }
 0x9d3   :  { %860 = vrot.lane.b32.xlu1 %v1542_v38, %s1713_s20 }
 0x9ea   :  { %v775_v39 = vpop.f32.mrf.mxu1 }
 0x9eb   :  { %v776_v7 = vadd.f32 %v1866_v51, %v775_v39 }
 0x9ed   :  { %1543 = vtanh.f32 %v776_v7  ;;  %v1432_v44 = vmul.f32 -1.442695, %v776_v7 }
 0x9ee   :  { %1545 = vpow2.f32 %v1434_v41 }
 0x9ef   :  { %1547 = vpow2.f32 %v1432_v44 }
 0x9f3   :  { %v1544_v40 = vpop.eup %1543 }
 0x9f4   :  { %800 = vrot.lane.b32.xlu2 %v1544_v40, %s1713_s20  ;;  %v1546_v8 = vpop.eup %1545 }
 0x9f5   :  { %v841_v9 = vadd.f32 1.0, %v1546_v8  ;;  %v1548_v10 = vpop.eup %1547 }
 0x9f6   :  { %v781_v11 = vadd.f32 1.0, %v1548_v10 }
 0x9f7   :  { %1549 = vrcp.f32 %v841_v9  ;;  %v853_v19 = vand.u32 2147483648, %v841_v9  ;;  %vm847_vm15 = vweird.f32 %v841_v9  ;;  %v851_v21 = vand.u32 2147483647, %v841_v9 }
 0x9f8   :  { %1551 = vrcp.f32 %v781_v11  ;;  %v793_v29 = vand.u32 2147483648, %v781_v11  ;;  %vm787_vm7 = vweird.f32 %v781_v11  ;;  %v791_v30 = vand.u32 2147483647, %v781_v11 }
 0x9f9   :  { %v854_v23 = vor.u32 1.1754944e-38, %v853_v19  ;;  %vm852_vm5 = vcmp.eq.f32.partialorder %v851_v21, 8.507059e+37 }
 0x9fa   :  { %v794_v32 = vor.u32 1.1754944e-38, %v793_v29  ;;  %vm792_vm11 = vcmp.eq.f32.partialorder %v791_v30, 8.507059e+37 }
 0x9fd   :  { %v1550_v12 = vpop.eup %1549 }
 0x9fe   :  { %v843_v13 = vmul.f32 %v1550_v12, %v841_v9  ;;  %v1552_v15 = vpop.eup %1551  ;;  %vm848_vm14 = vweird.f32 %v1550_v12 }
 0x9ff   :  { %v783_v17 = vmul.f32 %v1552_v15, %v781_v11  ;;  %vm849_vm4 = vmor %vm847_vm15, %vm848_vm14  ;;  %vm788_vm6 = vweird.f32 %v1552_v15 }
 0xa00   :  { %v844_v14 = vsub.f32 1.0, %v843_v13  ;;  %vm789_vm10 = vmor %vm787_vm7, %vm788_vm6 }
 0xa01   :  { %v784_v20 = vsub.f32 1.0, %v783_v17 }
 0xa02   :  { %v845_v16 = vmul.f32 %v1550_v12, %v844_v14 }
 0xa03   :  { %v785_v24 = vmul.f32 %v1552_v15, %v784_v20 }
 0xa04   :  { %v846_v18 = vadd.f32 %v1550_v12, %v845_v16 }
 0xa05   :  { %v786_v28 = vadd.f32 %v1552_v15, %v785_v24 }
 0xa06   :  { %v850_v22 = vsel %vm849_vm4, %v1550_v12, %v846_v18 }
 0xa07   :  { %v855_v26 = vsel %vm852_vm5, %v854_v23, %v850_v22  ;;  %v790_v31 = vsel %vm789_vm10, %v1552_v15, %v786_v28 }
 0xa08   :  { %v795_v43 = vsel %vm792_vm11, %v794_v32, %v790_v31  ;;  %v858_v46 = vmul.f32 %v855_v26, %v1970_v54 }
 0xa09   :  { %v798_v50 = vmul.f32 %v795_v43, %v1975_v47 }
 0xa45   :  { %v861_v25 = vpop.permute.xlu1 %860 }
 0xa46   :  { %v863_v27 = vmul.f32 %v861_v25, %v855_v26 }
 0xa48   :  { %865 = vrot.lane.b32.xlu0 %v863_v27, %s1714_s21 }
 0xa4e   :  { %v801_v34 = vpop.permute.xlu2 %800 }
 0xa4f   :  { %v803_v45 = vmul.f32 %v801_v34, %v795_v43 }
 0xa51   :  { %805 = vrot.lane.b32.xlu1 %v803_v45, %s1714_s21 }
 0xaba   :  { %v866_v48 = vpop.permute.xlu0 %865 }
 0xabb   :  { %v1998_v49 = vadd.f32 %v866_v48, %v858_v46 }
 0xabd   :  { %1553 = vtanh.f32 %v1998_v49 }
 0xac3   :  { %v1554_v33 = vpop.eup %1553  ;;  %v806_v52 = vpop.permute.xlu1 %805 }
 0xac4   :  { %v2002_v55 = vadd.f32 %v806_v52, %v798_v50  ;;  %871 = vrot.lane.b32.xlu2 %v1554_v33, %s1713_s20 }
 0xac6   :  { %1555 = vtanh.f32 %v2002_v55 }
 0xacc   :  { %v1556_v56 = vpop.eup %1555 }
 0xacd   :  { %811 = vrot.lane.b32.xlu0 %v1556_v56, %s1713_s20 }
 0xb1e   :  { %v872_v58 = vpop.permute.xlu2 %871 }
 0xb1f   :  { %v874_v54 = vmul.f32 %v872_v58, %v855_v26 }
 0xb21   :  { %876 = vrot.lane.b32.xlu1 %v874_v54, %s1714_s21 }
 0xb3f   :  { %v812_v47 = vpop.permute.xlu0 %811 }
 0xb40   :  { %v814_v59 = vmul.f32 %v812_v47, %v795_v43  ;;  %v1479_v47 = vld [vmem:[%s251_s13] ss:$0 sm:$0xff] }
 0xb42   :  { %880 = vrot.lane.b32.xlu2 %v814_v59, %s1713_s20  ;;  %v249_v59 = vld [vmem:[%s248_s15] sm:$0x1] }
 0xb93   :  { %v877_v42 = vpop.permute.xlu1 %876 }
 0xb94   :  { %1437 = vmatmul.msk.f32.vlgmr.msra.gmra.mxu2 %vm297_vm8, %v877_v42 }
 0xb9c   :  { %v881_v53 = vpop.permute.xlu2 %880 }
 0xb9d   :  { %v883_v60 = vsel %vm297_vm8, %v877_v42, %v881_v53  ;;  %v1480_v42 = vld [vmem:[%s254_s1] ss:$0 sm:$0xff]  ;;  %v268_v53 = vsel %vm114_vm0, %v249_v59, %v1479_v47 }
 0xb9e   :  { %1435 = vmatmul.msk.f32.vlgmr.msrb.gmra.mxu0 %vm367_vm9, %v883_v60  ;;  %v1481_v60 = vld [vmem:[%s257_s3] ss:$0 sm:$0xff]  ;;  %v269_v57 = vsel %vm116_vm1, %v268_v53, %v1480_v42 }
 0xb9f   :  { %v270_v4 = vsel %vm118_vm2, %v269_v57, %v1481_v60  ;;  %v1484_v47 = vld [vmem:[%s282_s24] ss:$0 sm:$0xff] }
 0xba0   :  { %v271_v5 = vsel %vm120_vm3, %v270_v4, 0.0 }
 0xc17   :  { %v963_v36 = vpop.f32.mrf.mxu2 }
 0xc18   :  { %v966_v0 = vadd.f32 %v963_v36, %v246_v35 }
 0xc1a   :  { %1557 = vtanh.f32 %v966_v0  ;;  %v1438_v38 = vmul.f32 -1.442695, %v966_v0 }
 0xc1b   :  { %v904_v1 = vpop.f32.mrf.mxu0 }
 0xc1c   :  { %v905_v2 = vadd.f32 %v1866_v51, %v904_v1 }
 0xc1e   :  { %1559 = vtanh.f32 %v905_v2  ;;  %v1436_v39 = vmul.f32 -1.442695, %v905_v2 }
 0xc1f   :  { %1561 = vpow2.f32 %v1438_v38 }
 0xc20   :  { %v1558_v3 = vpop.eup %1557  ;;  %1563 = vpow2.f32 %v1436_v39 }
 0xc21   :  { %989 = vrot.lane.b32.xlu1 %v1558_v3, %s1713_s20 }
 0xc24   :  { %v1560_v37 = vpop.eup %1559 }
 0xc25   :  { %929 = vrot.lane.b32.xlu0 %v1560_v37, %s1713_s20  ;;  %v1562_v7 = vpop.eup %1561 }
 0xc26   :  { %v970_v40 = vadd.f32 1.0, %v1562_v7  ;;  %v1564_v41 = vpop.eup %1563 }
 0xc27   :  { %v910_v44 = vadd.f32 1.0, %v1564_v41 }
 0xc28   :  { %1565 = vrcp.f32 %v970_v40  ;;  %v982_v16 = vand.u32 2147483648, %v970_v40  ;;  %vm976_vm13 = vweird.f32 %v970_v40  ;;  %v980_v17 = vand.u32 2147483647, %v970_v40 }
 0xc29   :  { %1567 = vrcp.f32 %v910_v44  ;;  %v922_v21 = vand.u32 2147483648, %v910_v44  ;;  %vm916_vm5 = vweird.f32 %v910_v44  ;;  %v920_v22 = vand.u32 2147483647, %v910_v44 }
 0xc2a   :  { %v983_v20 = vor.u32 1.1754944e-38, %v982_v16  ;;  %vm981_vm4 = vcmp.eq.f32.partialorder %v980_v17, 8.507059e+37 }
 0xc2b   :  { %v923_v27 = vor.u32 1.1754944e-38, %v922_v21  ;;  %vm921_vm7 = vcmp.eq.f32.partialorder %v920_v22, 8.507059e+37 }
 0xc2e   :  { %v1566_v8 = vpop.eup %1565 }
 0xc2f   :  { %v972_v9 = vmul.f32 %v1566_v8, %v970_v40  ;;  %v1568_v51 = vpop.eup %1567  ;;  %vm977_vm12 = vweird.f32 %v1566_v8 }
 0xc30   :  { %v912_v11 = vmul.f32 %v1568_v51, %v910_v44  ;;  %vm978_vm14 = vmor %vm976_vm13, %vm977_vm12  ;;  %vm917_vm15 = vweird.f32 %v1568_v51 }
 0xc31   :  { %v973_v10 = vsub.f32 1.0, %v972_v9  ;;  %vm918_vm6 = vmor %vm916_vm5, %vm917_vm15 }
 0xc32   :  { %v913_v13 = vsub.f32 1.0, %v912_v11 }
 0xc33   :  { %v974_v12 = vmul.f32 %v1566_v8, %v973_v10 }
 0xc34   :  { %v914_v15 = vmul.f32 %v1568_v51, %v913_v13 }
 0xc35   :  { %v975_v14 = vadd.f32 %v1566_v8, %v974_v12 }
 0xc36   :  { %v915_v19 = vadd.f32 %v1568_v51, %v914_v15 }
 0xc37   :  { %v979_v18 = vsel %vm978_vm14, %v1566_v8, %v975_v14 }
 0xc38   :  { %v984_v24 = vsel %vm981_vm4, %v983_v20, %v979_v18  ;;  %v919_v26 = vsel %vm918_vm6, %v1568_v51, %v915_v19 }
 0xc39   :  { %v924_v29 = vsel %vm921_vm7, %v923_v27, %v919_v26  ;;  %v987_v45 = vmul.f32 %v984_v24, %v1998_v49 }
 0xc3a   :  { %v927_v31 = vmul.f32 %v924_v29, %v2002_v55 }
 0xc93   :  { %v990_v23 = vpop.permute.xlu1 %989 }
 0xc94   :  { %v992_v25 = vmul.f32 %v990_v23, %v984_v24 }
 0xc96   :  { %994 = vrot.lane.b32.xlu0 %v992_v25, %s1714_s21 }
 0xc97   :  { %v930_v28 = vpop.permute.xlu0 %929 }
 0xc98   :  { %v932_v30 = vmul.f32 %v930_v28, %v924_v29 }
 0xc9a   :  { %934 = vrot.lane.b32.xlu2 %v932_v30, %s1714_s21 }
 0xcf4   :  { %v935_v32 = vpop.permute.xlu2 %934 }
 0xcf5   :  { %v2022_v34 = vadd.f32 %v935_v32, %v927_v31 }
 0xcf7   :  { %1569 = vtanh.f32 %v2022_v34 }
 0xcfd   :  { %v1570_v43 = vpop.eup %1569 }
 0xcfe   :  { %940 = vrot.lane.b32.xlu1 %v1570_v43, %s1713_s20 }
 0xd08   :  { %v995_v46 = vpop.permute.xlu0 %994 }
 0xd09   :  { %v2027_v48 = vadd.f32 %v995_v46, %v987_v45 }
 0xd0b   :  { %1571 = vtanh.f32 %v2027_v48 }
 0xd11   :  { %v1572_v50 = vpop.eup %1571 }
 0xd12   :  { %1000 = vrot.lane.b32.xlu2 %v1572_v50, %s1713_s20 }
 0xd6c   :  { %v1001_v33 = vpop.permute.xlu2 %1000 }
 0xd6d   :  { %v1003_v52 = vmul.f32 %v1001_v33, %v984_v24 }
 0xd6f   :  { %1005 = vrot.lane.b32.xlu0 %v1003_v52, %s1714_s21 }
 0xd70   :  { %v941_v55 = vpop.permute.xlu1 %940 }
 0xd71   :  { %v943_v56 = vmul.f32 %v941_v55, %v924_v29 }
 0xd73   :  { %1009 = vrot.lane.b32.xlu1 %v943_v56, %s1713_s20  ;;  %v1482_v56 = vld [vmem:[%s276_s22] ss:$0 sm:$0xff] }
 0xde1   :  { %v1006_v58 = vpop.permute.xlu0 %1005 }
 0xde5   :  { %v1010_v54 = vpop.permute.xlu1 %1009 }
 0xde6   :  { %v1012_v49 = vsel %vm297_vm8, %v1006_v58, %v1010_v54  ;;  %v1483_v54 = vld [vmem:[%s279_s23] ss:$0 sm:$0xff] }
 0xde7   :  { %1439 = vmatmul.msk.f32.vlgmr.msra.gmra.mxu3 %vm367_vm9, %v1012_v49 }
 0xdef   :  { %1441 = vmatmul.msk.f32.vlgmr.msrb.gmra.mxu3 %vm297_vm8, %v1006_v58  ;;  %v274_v58 = vld [vmem:[%s273_s26] sm:$0x1] }
 0xdf0   :  { %v293_v49 = vsel %vm114_vm0, %v274_v58, %v1482_v56 }
 0xdf1   :  { %v294_v59 = vsel %vm116_vm1, %v293_v49, %v1483_v54 }
 0xdf2   :  { %v295_v42 = vsel %vm118_vm2, %v294_v59, %v1484_v47 }
 0xdf3   :  { %v296_v53 = vsel %vm120_vm3, %v295_v42, 0.0 }
 0xe6a   :  { %v1033_v61 = vpop.f32.mrf.mxu3 }
 0xe6b   :  { %v1034_v63 = vadd.f32 %v2041_v62, %v1033_v61 }
 0xe6d   :  { %1573 = vtanh.f32 %v1034_v63  ;;  %v1440_v1 = vmul.f32 -1.442695, %v1034_v63 }
 0xe72   :  { %v1092_v6 = vpop.f32.mrf.mxu3 }
 0xe73   :  { %v1574_v35 = vpop.eup %1573  ;;  %v1095_v36 = vadd.f32 %v1092_v6, %v271_v5 }
 0xe74   :  { %1058 = vrot.lane.b32.xlu2 %v1574_v35, %s1713_s20 }
 0xe75   :  { %1575 = vtanh.f32 %v1095_v36  ;;  %v1442_v7 = vmul.f32 -1.442695, %v1095_v36 }
 0xe76   :  { %1577 = vpow2.f32 %v1440_v1 }
 0xe7b   :  { %v1576_v0 = vpop.eup %1575 }
 0xe7c   :  { %1118 = vrot.lane.b32.xlu0 %v1576_v0, %s1713_s20  ;;  %v1578_v2 = vpop.eup %1577 }
 0xe7d   :  { %v1039_v3 = vadd.f32 1.0, %v1578_v2 }
 0xe7f   :  { %1579 = vrcp.f32 %v1039_v3  ;;  %v1051_v44 = vand.u32 2147483648, %v1039_v3  ;;  %vm1045_vm11 = vweird.f32 %v1039_v3  ;;  %v1049_v8 = vand.u32 2147483647, %v1039_v3 }
 0xe80   :  { %1581 = vpow2.f32 %v1442_v7 }
 0xe81   :  { %v1052_v10 = vor.u32 1.1754944e-38, %v1051_v44  ;;  %vm1050_vm13 = vcmp.eq.f32.partialorder %v1049_v8, 8.507059e+37 }
 0xe85   :  { %v1580_v37 = vpop.eup %1579 }
 0xe86   :  { %v1041_v38 = vmul.f32 %v1580_v37, %v1039_v3  ;;  %vm1046_vm10 = vweird.f32 %v1580_v37  ;;  %v1582_v9 = vpop.eup %1581 }
 0xe87   :  { %vm1047_vm12 = vmor %vm1045_vm11, %vm1046_vm10  ;;  %v1099_v11 = vadd.f32 1.0, %v1582_v9 }
 0xe88   :  { %v1042_v39 = vsub.f32 1.0, %v1041_v38 }
 0xe89   :  { %1583 = vrcp.f32 %v1099_v11  ;;  %v1111_v20 = vand.u32 2147483648, %v1099_v11  ;;  %vm1105_vm15 = vweird.f32 %v1099_v11  ;;  %v1109_v21 = vand.u32 2147483647, %v1099_v11 }
 0xe8a   :  { %v1043_v40 = vmul.f32 %v1580_v37, %v1042_v39 }
 0xe8b   :  { %v1112_v23 = vor.u32 1.1754944e-38, %v1111_v20  ;;  %vm1110_vm5 = vcmp.eq.f32.partialorder %v1109_v21, 8.507059e+37 }
 0xe8c   :  { %v1044_v41 = vadd.f32 %v1580_v37, %v1043_v40 }
 0xe8e   :  { %v1048_v51 = vsel %vm1047_vm12, %v1580_v37, %v1044_v41 }
 0xe8f   :  { %v1053_v13 = vsel %vm1050_vm13, %v1052_v10, %v1048_v51  ;;  %v1584_v15 = vpop.eup %1583 }
 0xe90   :  { %v1101_v16 = vmul.f32 %v1584_v15, %v1099_v11  ;;  %vm1106_vm14 = vweird.f32 %v1584_v15  ;;  %v1056_v27 = vmul.f32 %v1053_v13, %v2022_v34 }
 0xe91   :  { %vm1107_vm4 = vmor %vm1105_vm15, %vm1106_vm14 }
 0xe92   :  { %v1102_v17 = vsub.f32 1.0, %v1101_v16 }
 0xe94   :  { %v1103_v18 = vmul.f32 %v1584_v15, %v1102_v17 }
 0xe96   :  { %v1104_v19 = vadd.f32 %v1584_v15, %v1103_v18 }
 0xe98   :  { %v1108_v22 = vsel %vm1107_vm4, %v1584_v15, %v1104_v19  ;;  %vm1345_vm4 = vcmask 785408  }
 0xe99   :  { %v1113_v25 = vsel %vm1110_vm5, %v1112_v23, %v1108_v22 }
 0xe9a   :  { %v1116_v30 = vmul.f32 %v1113_v25, %v2027_v48 }
 0xece   :  { %v1059_v12 = vpop.permute.xlu2 %1058 }
 0xecf   :  { %v1061_v14 = vmul.f32 %v1059_v12, %v1053_v13 }
 0xed1   :  { %1063 = vrot.lane.b32.xlu1 %v1061_v14, %s1714_s21 }
 0xeee   :  { %v1119_v24 = vpop.permute.xlu0 %1118 }
 0xeef   :  { %v1121_v26 = vmul.f32 %v1119_v24, %v1113_v25 }
 0xef1   :  { %1123 = vrot.lane.b32.xlu2 %v1121_v26, %s1714_s21 }
 0xf43   :  { %v1064_v28 = vpop.permute.xlu1 %1063 }
 0xf44   :  { %v2051_v29 = vadd.f32 %v1064_v28, %v1056_v27 }
 0xf46   :  { %1585 = vtanh.f32 %v2051_v29 }
 0xf4b   :  { %v1124_v31 = vpop.permute.xlu2 %1123 }
 0xf4c   :  { %v1586_v32 = vpop.eup %1585  ;;  %v2055_v43 = vadd.f32 %v1124_v31, %v1116_v30 }
 0xf4d   :  { %1069 = vrot.lane.b32.xlu0 %v1586_v32, %s1713_s20 }
 0xf4e   :  { %1587 = vtanh.f32 %v2055_v43 }
 0xf54   :  { %v1588_v45 = vpop.eup %1587 }
 0xf55   :  { %1129 = vrot.lane.b32.xlu1 %v1588_v45, %s1713_s20 }
 0xfbf   :  { %v1070_v34 = vpop.permute.xlu0 %1069 }
 0xfc0   :  { %v1072_v46 = vmul.f32 %v1070_v34, %v1053_v13 }
 0xfc2   :  { %1138 = vrot.lane.b32.xlu0 %v1072_v46, %s1713_s20 }
 0xfc7   :  { %v1130_v48 = vpop.permute.xlu1 %1129 }
 0xfc8   :  { %v1132_v50 = vmul.f32 %v1130_v48, %v1113_v25 }
 0xfca   :  { %1134 = vrot.lane.b32.xlu2 %v1132_v50, %s1714_s21 }
0x1024   :  { %v1135_v33 = vpop.permute.xlu2 %1134 }
0x1025   :  { %1445 = vmatmul.msk.f32.vlgmr.msra.gmra.mxu0 %vm297_vm8, %v1135_v33 }
0x1034   :  { %v1139_v52 = vpop.permute.xlu0 %1138 }
0x1035   :  { %v1141_v55 = vsel %vm297_vm8, %v1135_v33, %v1139_v52 }
0x1036   :  { %1443 = vmatmul.msk.f32.vlgmr.msrb.gmra.mxu2 %vm367_vm9, %v1141_v55 }
0x10a2   :  { %v1221_v60 = vpop.f32.mrf.mxu0 }
0x10a3   :  { %v1224_v61 = vadd.f32 %v1221_v60, %v296_v53 }
0x10a5   :  { %1589 = vtanh.f32 %v1224_v61  ;;  %v1446_v6 = vmul.f32 -1.442695, %v1224_v61 }
0x10ab   :  { %v1590_v57 = vpop.eup %1589 }
0x10ac   :  { %1247 = vrot.lane.b32.xlu2 %v1590_v57, %s1713_s20 }
0x10b9   :  { %v1162_v63 = vpop.f32.mrf.mxu2 }
0x10ba   :  { %v1163_v4 = vadd.f32 %v2041_v62, %v1162_v63 }
0x10bc   :  { %1591 = vtanh.f32 %v1163_v4  ;;  %v1444_v9 = vmul.f32 -1.442695, %v1163_v4 }
0x10bd   :  { %1593 = vpow2.f32 %v1446_v6 }
0x10c2   :  { %v1592_v5 = vpop.eup %1591 }
0x10c3   :  { %1187 = vrot.lane.b32.xlu1 %v1592_v5, %s1713_s20  ;;  %v1594_v35 = vpop.eup %1593 }
0x10c4   :  { %v1228_v36 = vadd.f32 1.0, %v1594_v35 }
0x10c6   :  { %1595 = vrcp.f32 %v1228_v36  ;;  %v1240_v38 = vand.u32 2147483648, %v1228_v36  ;;  %vm1234_vm1 = vweird.f32 %v1228_v36  ;;  %v1238_v39 = vand.u32 2147483647, %v1228_v36 }
0x10c7   :  { %1597 = vpow2.f32 %v1444_v9 }
0x10c8   :  { %v1241_v40 = vor.u32 1.1754944e-38, %v1240_v38  ;;  %vm1239_vm3 = vcmp.eq.f32.partialorder %v1238_v39, 8.507059e+37 }
0x10cc   :  { %v1596_v0 = vpop.eup %1595 }
0x10cd   :  { %v1230_v1 = vmul.f32 %v1596_v0, %v1228_v36  ;;  %vm1235_vm0 = vweird.f32 %v1596_v0  ;;  %v1598_v51 = vpop.eup %1597 }
0x10ce   :  { %vm1236_vm2 = vmor %vm1234_vm1, %vm1235_vm0  ;;  %v1168_v10 = vadd.f32 1.0, %v1598_v51 }
0x10cf   :  { %v1231_v2 = vsub.f32 1.0, %v1230_v1 }
0x10d0   :  { %1599 = vrcp.f32 %v1168_v10  ;;  %v1180_v16 = vand.u32 2147483648, %v1168_v10  ;;  %vm1174_vm7 = vweird.f32 %v1168_v10  ;;  %v1178_v17 = vand.u32 2147483647, %v1168_v10 }
0x10d1   :  { %v1232_v3 = vmul.f32 %v1596_v0, %v1231_v2 }
0x10d2   :  { %v1181_v19 = vor.u32 1.1754944e-38, %v1180_v16  ;;  %vm1179_vm11 = vcmp.eq.f32.partialorder %v1178_v17, 8.507059e+37 }
0x10d3   :  { %v1233_v37 = vadd.f32 %v1596_v0, %v1232_v3 }
0x10d5   :  { %v1237_v7 = vsel %vm1236_vm2, %v1596_v0, %v1233_v37 }
0x10d6   :  { %v1242_v44 = vsel %vm1239_vm3, %v1241_v40, %v1237_v7  ;;  %v1600_v11 = vpop.eup %1599 }
0x10d7   :  { %v1170_v12 = vmul.f32 %v1600_v11, %v1168_v10  ;;  %vm1175_vm6 = vweird.f32 %v1600_v11  ;;  %v1245_v23 = vmul.f32 %v1242_v44, %v2055_v43 }
0x10d8   :  { %vm1176_vm10 = vmor %vm1174_vm7, %vm1175_vm6 }
0x10d9   :  { %v1171_v13 = vsub.f32 1.0, %v1170_v12 }
0x10db   :  { %v1172_v14 = vmul.f32 %v1600_v11, %v1171_v13 }
0x10dd   :  { %v1173_v15 = vadd.f32 %v1600_v11, %v1172_v14 }
0x10df   :  { %v1177_v18 = vsel %vm1176_vm10, %v1600_v11, %v1173_v15 }
0x10e0   :  { %v1182_v21 = vsel %vm1179_vm11, %v1181_v19, %v1177_v18 }
0x10e1   :  { %v1185_v27 = vmul.f32 %v1182_v21, %v2051_v29 }
0x1106   :  { %v1248_v41 = vpop.permute.xlu2 %1247 }
0x1107   :  { %v1250_v8 = vmul.f32 %v1248_v41, %v1242_v44 }
0x1109   :  { %1252 = vrot.lane.b32.xlu1 %v1250_v8, %s1714_s21 }
0x1135   :  { %v1188_v20 = vpop.permute.xlu1 %1187 }
0x1136   :  { %v1190_v22 = vmul.f32 %v1188_v20, %v1182_v21 }
0x1138   :  { %1192 = vrot.lane.b32.xlu0 %v1190_v22, %s1714_s21 }
0x117b   :  { %v1253_v24 = vpop.permute.xlu1 %1252 }
0x117c   :  { %v1255_v25 = vadd.f32 %v1253_v24, %v1245_v23 }
0x117e   :  { %1601 = vtanh.f32 %v1255_v25 }
0x1184   :  { %v1602_v26 = vpop.eup %1601 }
0x1185   :  { %1258 = vrot.lane.b32.xlu0 %v1602_v26, %s1713_s20 }
0x11aa   :  { %v1193_v28 = vpop.permute.xlu0 %1192 }
0x11ab   :  { %v1195_v30 = vadd.f32 %v1193_v28, %v1185_v27 }
0x11ad   :  { %1603 = vtanh.f32 %v1195_v30 }
0x11b3   :  { %v1604_v31 = vpop.eup %1603 }
0x11b4   :  { %1198 = vrot.lane.b32.xlu2 %v1604_v31, %s1713_s20 }
0x11f7   :  { %v1259_v32 = vpop.permute.xlu0 %1258 }
0x11f8   :  { %v1261_v45 = vmul.f32 %v1259_v32, %v1242_v44 }
0x11fa   :  { %1263 = vrot.lane.b32.xlu1 %v1261_v45, %s1714_s21 }
0x120e   :  { %v1199_v34 = vpop.permute.xlu2 %1198 }
0x120f   :  { %v1201_v43 = vmul.f32 %v1199_v34, %v1182_v21 }
0x1211   :  { %1267 = vrot.lane.b32.xlu2 %v1201_v43, %s1713_s20 }
0x126b   :  { %v1268_v46 = vpop.permute.xlu2 %1267 }
0x126c   :  { %v1264_v48 = vpop.permute.xlu1 %1263 }
0x126d   :  { %v1270_v50 = vsel %vm297_vm8, %v1264_v48, %v1268_v46 }
0x126e   :  { %1447 = vmatmul.msk.f32.vlgmr.msra.gmra.mxu1 %vm367_vm9, %v1270_v50 }
0x12eb   :  { %v1291_v29 = vpop.f32.mrf.mxu1 }
0x12ec   :  { %v1292_v33 = vadd.f32 %v2041_v62, %v1291_v29 }
0x12ee   :  { %1605 = vtanh.f32 %v1292_v33  ;;  %v1448_v55 = vmul.f32 -1.442695, %v1292_v33 }
0x12f0   :  { %1607 = vpow2.f32 %v1448_v55 }
0x12f4   :  { %v1606_v52 = vpop.eup %1605 }
0x12f5   :  { %1316 = vrot.lane.b32.xlu0 %v1606_v52, %s1713_s20 }
0x12f6   :  { %v1608_v56 = vpop.eup %1607 }
0x12f7   :  { %v1297_v58 = vadd.f32 1.0, %v1608_v56 }
0x12f9   :  { %1609 = vrcp.f32 %v1297_v58  ;;  %v1309_v53 = vand.u32 2147483648, %v1297_v58  ;;  %vm1303_vm13 = vweird.f32 %v1297_v58  ;;  %v1307_v60 = vand.u32 2147483647, %v1297_v58 }
0x12fb   :  { %v1310_v61 = vor.u32 1.1754944e-38, %v1309_v53  ;;  %vm1308_vm15 = vcmp.eq.f32.partialorder %v1307_v60, 8.507059e+37 }
0x12ff   :  { %v1610_v54 = vpop.eup %1609 }
0x1300   :  { %v1299_v49 = vmul.f32 %v1610_v54, %v1297_v58  ;;  %vm1304_vm12 = vweird.f32 %v1610_v54 }
0x1301   :  { %vm1305_vm14 = vmor %vm1303_vm13, %vm1304_vm12 }
0x1302   :  { %v1300_v47 = vsub.f32 1.0, %v1299_v49 }
0x1304   :  { %v1301_v59 = vmul.f32 %v1610_v54, %v1300_v47 }
0x1306   :  { %v1302_v42 = vadd.f32 %v1610_v54, %v1301_v59 }
0x1308   :  { %v1306_v62 = vsel %vm1305_vm14, %v1610_v54, %v1302_v42 }
0x1309   :  { %v1311_v63 = vsel %vm1308_vm15, %v1310_v61, %v1306_v62 }
0x130a   :  { %v1314_v5 = vmul.f32 %v1311_v63, %v1195_v30 }
0x1367   :  { %v1317_v57 = vpop.permute.xlu0 %1316 }
0x1368   :  { %v1319_v4 = vmul.f32 %v1317_v57, %v1311_v63 }
0x136a   :  { %1321 = vrot.lane.b32.xlu1 %v1319_v4, %s1714_s21 }
0x1372   :  { %1336 = vrot.lane.b32.xlu1 %v1255_v25, %s1714_s21 }
0x13dc   :  { %v1322_v6 = vpop.permute.xlu1 %1321 }
0x13dd   :  { %v1324_v35 = vadd.f32 %v1322_v6, %v1314_v5 }
0x13df   :  { %1611 = vtanh.f32 %v1324_v35 }
0x13e4   :  { %v1337_v3 = vpop.permute.xlu1 %1336 }
0x13e5   :  { %v1612_v36 = vpop.eup %1611 }
0x13e6   :  { %1327 = vrot.lane.b32.xlu2 %v1612_v36, %s1713_s20 }
0x13ee   :  { %1340 = vrot.lane.b32.xlu2 %v1324_v35, %s1713_s20 }
0x1440   :  { %v1328_v0 = vpop.permute.xlu2 %1327 }
0x1441   :  { %v1330_v1 = vmul.f32 %v1328_v0, %v1311_v63 }
0x1443   :  { %1332 = vrot.lane.b32.xlu0 %v1330_v1, %s1713_s20 }
0x1448   :  { %v1341_v38 = vpop.permute.xlu2 %1340 }
0x14b5   :  { %v1333_v2 = vpop.permute.xlu0 %1332 }
0x14b6   :  { %v1343_v37 = vsel %vm297_vm8, %v1264_v48, %v1333_v2 }
0x14b7   :  { %v1344_v39 = vsel %vm367_vm9, %v1343_v37, %v1337_v3 }
0x14b8   :  { %v1346_v7 = vsel %vm1345_vm4, %v1344_v39, %v1341_v38 }
0x14b9   :  { %1347 = vst [vmem:[%s2099_s5] sm:$0xff] %v1346_v7 }
0x14ba   :  { %1352 = vsyncpa [#allocation3], 1 }
0x14bb   :  { %1353 = vsyncpa [#allocation7], 1 }
0x14bc   :  { %1354 = vsyncpa [#allocation4], 1 }

</bundles_post_ra>
